<compile_context>
chip_gen: v6e
topology: v6e:2x2x1
jax: 0.10.0
libtpu: 0.0.40
codegen_flags: <defaults>
</compile_context>

<pallas_src>
import jax
import jax.numpy as jnp
from jax.experimental import pallas as pl
from jax.experimental.pallas import tpu as pltpu

B, C_IN, H, W = 2, 4, 16, 16
C_OUT, K, STRIDE, PAD = 8, 3, 2, 1
OH = OW = (H + 2 * PAD - K) // STRIDE + 1          # 8
OHW = OH * OW                                      # 64
KKC = C_IN * K * K                                 # 36
FEATURE = C_OUT * OHW                              # 512
HID = 128                                          # linear / mcb / bn width
CLIN = 5
NCLS = 2
BN_EPS = 1e-5


# --------------------------- fused forward kernel ---------------------------
def fused_kernel(clin_ref,      # SMEM (B, CLIN)            clinical features (raw)
                 patches_ref,   # VMEM (B, KKC, OHW)        im2col patches (per batch)
                 wconv_ref,     # VMEM (C_OUT, KKC)         conv weight, transposed GEMM form
                 bconv_ref,     # VMEM (C_OUT, 1)           conv bias
                 wlin_ref,      # VMEM (C_OUT, OHW, HID)    linear weight, NCHW-flatten folded in
                 blin_ref,      # VMEM (1, HID)
                 mfold_ref,     # VMEM (HID, (CLIN+1)*HID)  CBP matrix with clinical Linear folded in
                 gamma_ref,     # VMEM (1, HID)
                 beta_ref,      # VMEM (1, HID)
                 wcls_ref,      # VMEM (HID, NCLS)
                 bcls_ref,      # VMEM (1, NCLS)
                 o_ref):        # VMEM (B, NCLS)
    wconv = wconv_ref[...]                              # (8, 36)
    bconv = bconv_ref[...]                              # (8, 1)
    blin = blin_ref[...]                                # (1, 128)
    w_lin_slabs = [wlin_ref[c] for c in range(C_OUT)]   # each (64, 128)

    # Conv (im2col GEMM, transposed/lane-dense) + bias + ReLU, then Linear(512,128).
    # feat[b, c*64+p] = relu(conv)[b, c, p]  =>  x[b] = b_lin + sum_c g_b[c,:] @ w_lin[c*64:(c+1)*64,:]
    x_rows = []
    for b in range(B):
        g = jnp.dot(wconv, patches_ref[b], preferred_element_type=jnp.float32)  # (8, 64)
        g = jnp.maximum(g + bconv, 0.0)
        acc = blin                                                               # (1, 128)
        for c in range(C_OUT):
            acc = acc + jnp.dot(g[c:c + 1, :], w_lin_slabs[c],
                                preferred_element_type=jnp.float32)
        x_rows.append(acc)
    x = jnp.concatenate(x_rows, axis=0)                                          # (B, 128)

    # Compact bilinear pooling with the clinical Linear(5,5) pre-folded into m_fold:
    #   t[:, i*HID:(i+1)*HID] = x @ N_i   (i < CLIN),   t[:, CLIN*HID:] = x @ N_bias
    #   mcb = t_bias + sum_i clinical[:, i] * t_i
    t = jnp.dot(x, mfold_ref[...], preferred_element_type=jnp.float32)           # (B, 768)
    mcb_rows = []
    for b in range(B):
        row = t[b:b + 1, CLIN * HID:(CLIN + 1) * HID]
        for j in range(CLIN):
            row = row + clin_ref[b, j] * t[b:b + 1, j * HID:(j + 1) * HID]       # SMEM scalar splat
        mcb_rows.append(row)
    mcb = jnp.concatenate(mcb_rows, axis=0)                                      # (B, 128)

    # BatchNorm1d (training mode: batch statistics, biased variance) + ReLU
    mean = jnp.mean(mcb, axis=0, keepdims=True)
    var = jnp.mean((mcb - mean) ** 2, axis=0, keepdims=True)
    y = (mcb - mean) * jax.lax.rsqrt(var + BN_EPS) * gamma_ref[...] + beta_ref[...]
    y = jnp.maximum(y, 0.0)

    # Classifier
    o_ref[...] = jnp.dot(y, wcls_ref[...], preferred_element_type=jnp.float32) + bcls_ref[...]


# ------------------------------ wrapper / prep ------------------------------
def im2col(x):
    """patches[b, c_in*K*K + kh*K + kw, oh*OW + ow]"""
    xp = jnp.pad(x, ((0, 0), (0, 0), (PAD, PAD), (PAD, PAD)))
    slabs = []
    for kh in range(K):
        for kw in range(K):
            slabs.append(xp[:, :, kh:kh + STRIDE * OH:STRIDE, kw:kw + STRIDE * OW:STRIDE])
    pt = jnp.stack(slabs, 0).reshape(K, K, B, C_IN, OH, OW)   # [kh, kw, b, c, oh, ow]
    pt = pt.transpose(2, 3, 0, 1, 4, 5)                       # [b, c, kh, kw, oh, ow]
    return pt.reshape(B, KKC, OHW)


def build_cbp_matrix(h1, s1, h2, s2):
    # M[i, j*HID + k] = s1[i] * s2[j] * [(h1[i] + h2[j]) % HID == k]
    kk = jnp.arange(HID)
    tgt = (h1[:, None, None] + h2[None, :, None]) % HID            # (HID, CLIN, 1)
    m = (kk[None, None, :] == tgt).astype(jnp.float32)
    m = m * s1[:, None, None] * s2[None, :, None]                  # (HID, CLIN, HID)
    return m.reshape(HID, CLIN * HID)


def prepare_params(p):
    """One-time (hoisted) conversion of PyTorch-layout params into kernel layout."""
    m_stack = build_cbp_matrix(p["h1"], p["s1"], p["h2"], p["s2"])  # (HID, CLIN*HID)
    m_r = m_stack.reshape(HID, CLIN, HID)
    # Fold the clinical Linear(5,5) into the CBP matrix:
    #   N_i[d,k]   = sum_j w_cl[i,j] * m_r[d,j,k]
    #   N_bias[d,k]= sum_j b_cl[j]   * m_r[d,j,k]
    n_w = jnp.einsum("ij,djk->dik", p["w_cl"], m_r)                 # (HID, CLIN, HID)
    n_b = jnp.einsum("j,djk->dk", p["b_cl"], m_r)                   # (HID, HID)
    m_fold = jnp.concatenate([n_w.reshape(HID, CLIN * HID), n_b], axis=1)  # (HID, 768)
    return {
        "w_conv_t": p["w_conv"].reshape(C_OUT, KKC),                # (8, 36)
        "b_conv": p["b_conv"].reshape(C_OUT, 1),
        "w_lin_r": p["w_lin"].reshape(C_OUT, OHW, HID),             # NCHW flatten folded in
        "b_lin": p["b_lin"].reshape(1, HID),
        "m_fold": m_fold,
        "gamma": p["gamma"].reshape(1, HID),
        "beta": p["beta"].reshape(1, HID),
        "w_cls": p["w_cls"],
        "b_cls": p["b_cls"].reshape(1, NCLS),
    }


def forward(x, clinical, kp):
    patches = im2col(x)
    cost = pl.CostEstimate(
        flops=750_000,          # conv GEMM + linear + folded-CBP matmul + classifier
        transcendentals=128,    # rsqrt over HID
        bytes_accessed=720_000, # weights (w_lin 256KB, m_fold 384KB) dominate
    )
    vmem = pl.BlockSpec(memory_space=pltpu.MemorySpace.VMEM)
    smem = pl.BlockSpec(memory_space=pltpu.MemorySpace.SMEM)
    return pl.pallas_call(
        fused_kernel,
        out_shape=jax.ShapeDtypeStruct((B, NCLS), jnp.float32),
        in_specs=[smem] + [vmem] * 10,
        out_specs=vmem,
        cost_estimate=cost,
    )(clinical, patches,
      kp["w_conv_t"], kp["b_conv"], kp["w_lin_r"], kp["b_lin"],
      kp["m_fold"], kp["gamma"], kp["beta"], kp["w_cls"], kp["b_cls"])


# ------------------------------- pure-JAX reference -------------------------------
def reference(x, clinical, p):
    hp = jax.lax.Precision.HIGHEST
    out = jax.lax.conv_general_dilated(
        x, p["w_conv"], window_strides=(STRIDE, STRIDE),
        padding=((PAD, PAD), (PAD, PAD)),
        dimension_numbers=("NCHW", "OIHW", "NCHW"), precision=hp)
    out = jnp.maximum(out + p["b_conv"][None, :, None, None], 0.0)
    feat = out.reshape(B, -1)
    xl = jnp.dot(feat, p["w_lin"], precision=hp) + p["b_lin"]
    cl = jnp.dot(clinical, p["w_cl"], precision=hp) + p["b_cl"]
    # CBP reference: count sketch + FFT circular convolution
    sx = jnp.zeros((B, HID)).at[:, p["h1"]].add(xl * p["s1"])
    sc = jnp.zeros((B, HID)).at[:, p["h2"]].add(cl * p["s2"])
    cbp = jnp.fft.irfft(jnp.fft.rfft(sx, axis=1) * jnp.fft.rfft(sc, axis=1), n=HID, axis=1)
    mean = jnp.mean(cbp, axis=0, keepdims=True)
    var = jnp.mean((cbp - mean) ** 2, axis=0, keepdims=True)
    y = jnp.maximum((cbp - mean) * jax.lax.rsqrt(var + BN_EPS) * p["gamma"] + p["beta"], 0.0)
    return jnp.dot(y, p["w_cls"], precision=hp) + p["b_cls"]


def init_params():
    ks = jax.random.split(jax.random.PRNGKey(0), 12)
    return {
        "w_conv": 0.1 * jax.random.normal(ks[0], (C_OUT, C_IN, K, K), jnp.float32),
        "b_conv": 0.1 * jax.random.normal(ks[1], (C_OUT,), jnp.float32),
        "w_lin": 0.05 * jax.random.normal(ks[2], (FEATURE, HID), jnp.float32),   # (in, out)
        "b_lin": 0.05 * jax.random.normal(ks[3], (HID,), jnp.float32),
        "w_cl": 0.3 * jax.random.normal(ks[4], (CLIN, CLIN), jnp.float32),
        "b_cl": 0.3 * jax.random.normal(ks[5], (CLIN,), jnp.float32),
        "h1": jax.random.randint(ks[6], (HID,), 0, HID),
        "s1": jnp.where(jax.random.bernoulli(ks[7], 0.5, (HID,)), 1.0, -1.0),
        "h2": jax.random.randint(ks[8], (CLIN,), 0, HID),
        "s2": jnp.where(jax.random.bernoulli(ks[9], 0.5, (CLIN,)), 1.0, -1.0),
        "gamma": jnp.ones((HID,), jnp.float32),          # BatchNorm1d default init
        "beta": jnp.zeros((HID,), jnp.float32),
        "w_cls": 0.1 * jax.random.normal(ks[10], (HID, NCLS), jnp.float32),
        "b_cls": 0.1 * jax.random.normal(ks[11], (NCLS,), jnp.float32),
    }
    # TODO(synk): `self.dense` branch unused because the synthetic backbone's last
    # child is a plain Linear (not a Sequential), matching the else-branch.


if __name__ == "__main__":
    params = init_params()
    kparams = jax.tree_util.tree_map(jax.block_until_ready, prepare_params(params))  # hoisted, once

    kx, kc = jax.random.split(jax.random.PRNGKey(42))
    x = jax.random.normal(kx, (B, C_IN, H, W), jnp.float32)
    clinical = jax.random.normal(kc, (B, CLIN), jnp.float32)

    fwd = jax.jit(forward)
    out = jax.block_until_ready(fwd(x, clinical, kparams))

    ref = reference(x, clinical, params)
    assert out.shape == (B, NCLS)
    if not jnp.allclose(out, ref, atol=5e-2, rtol=5e-2):
        raise AssertionError(f"mismatch: pallas={out} reference={ref}")
    print("KERNEL_OK")
</pallas_src>

<mosaic_0001>
module attributes {stable_mosaic.version = 11 : i64} {
  func.func @fused_kernel(%arg0: memref<2x5xf32, #tpu.memory_space<smem>>, %arg1: memref<2x36x64xf32, #tpu.memory_space<vmem>>, %arg2: memref<8x36xf32, #tpu.memory_space<vmem>>, %arg3: memref<8x1xf32, #tpu.memory_space<vmem>>, %arg4: memref<8x64x128xf32, #tpu.memory_space<vmem>>, %arg5: memref<1x128xf32, #tpu.memory_space<vmem>>, %arg6: memref<128x768xf32, #tpu.memory_space<vmem>>, %arg7: memref<1x128xf32, #tpu.memory_space<vmem>>, %arg8: memref<1x128xf32, #tpu.memory_space<vmem>>, %arg9: memref<128x2xf32, #tpu.memory_space<vmem>>, %arg10: memref<1x2xf32, #tpu.memory_space<vmem>>, %arg11: memref<2x2xf32, #tpu.memory_space<vmem>>) attributes {dimension_semantics = [], scalar_prefetch = 0 : i64, scratch_operands = 0 : i64, tpu.core_type = #tpu.core_type<tc>} {
    %c0 = arith.constant 0 : index
    %c0_0 = arith.constant 0 : index
    %0 = vector.load %arg2[%c0, %c0_0] : memref<8x36xf32, #tpu.memory_space<vmem>>, vector<8x36xf32>
    %c0_1 = arith.constant 0 : index
    %c0_2 = arith.constant 0 : index
    %1 = vector.load %arg3[%c0_1, %c0_2] : memref<8x1xf32, #tpu.memory_space<vmem>>, vector<8x1xf32>
    %c0_3 = arith.constant 0 : index
    %c0_4 = arith.constant 0 : index
    %2 = vector.load %arg5[%c0_3, %c0_4] : memref<1x128xf32, #tpu.memory_space<vmem>>, vector<1x128xf32>
    %c0_5 = arith.constant 0 : index
    %c0_6 = arith.constant 0 : index
    %c0_7 = arith.constant 0 : index
    %3 = vector.load %arg4[%c0_5, %c0_6, %c0_7] : memref<8x64x128xf32, #tpu.memory_space<vmem>>, vector<1x64x128xf32>
    %4 = vector.shape_cast %3 : vector<1x64x128xf32> to vector<64x128xf32>
    %c1 = arith.constant 1 : index
    %c0_8 = arith.constant 0 : index
    %c0_9 = arith.constant 0 : index
    %5 = vector.load %arg4[%c1, %c0_8, %c0_9] : memref<8x64x128xf32, #tpu.memory_space<vmem>>, vector<1x64x128xf32>
    %6 = vector.shape_cast %5 : vector<1x64x128xf32> to vector<64x128xf32>
    %c2 = arith.constant 2 : index
    %c0_10 = arith.constant 0 : index
    %c0_11 = arith.constant 0 : index
    %7 = vector.load %arg4[%c2, %c0_10, %c0_11] : memref<8x64x128xf32, #tpu.memory_space<vmem>>, vector<1x64x128xf32>
    %8 = vector.shape_cast %7 : vector<1x64x128xf32> to vector<64x128xf32>
    %c3 = arith.constant 3 : index
    %c0_12 = arith.constant 0 : index
    %c0_13 = arith.constant 0 : index
    %9 = vector.load %arg4[%c3, %c0_12, %c0_13] : memref<8x64x128xf32, #tpu.memory_space<vmem>>, vector<1x64x128xf32>
    %10 = vector.shape_cast %9 : vector<1x64x128xf32> to vector<64x128xf32>
    %c4 = arith.constant 4 : index
    %c0_14 = arith.constant 0 : index
    %c0_15 = arith.constant 0 : index
    %11 = vector.load %arg4[%c4, %c0_14, %c0_15] : memref<8x64x128xf32, #tpu.memory_space<vmem>>, vector<1x64x128xf32>
    %12 = vector.shape_cast %11 : vector<1x64x128xf32> to vector<64x128xf32>
    %c5 = arith.constant 5 : index
    %c0_16 = arith.constant 0 : index
    %c0_17 = arith.constant 0 : index
    %13 = vector.load %arg4[%c5, %c0_16, %c0_17] : memref<8x64x128xf32, #tpu.memory_space<vmem>>, vector<1x64x128xf32>
    %14 = vector.shape_cast %13 : vector<1x64x128xf32> to vector<64x128xf32>
    %c6 = arith.constant 6 : index
    %c0_18 = arith.constant 0 : index
    %c0_19 = arith.constant 0 : index
    %15 = vector.load %arg4[%c6, %c0_18, %c0_19] : memref<8x64x128xf32, #tpu.memory_space<vmem>>, vector<1x64x128xf32>
    %16 = vector.shape_cast %15 : vector<1x64x128xf32> to vector<64x128xf32>
    %c7 = arith.constant 7 : index
    %c0_20 = arith.constant 0 : index
    %c0_21 = arith.constant 0 : index
    %17 = vector.load %arg4[%c7, %c0_20, %c0_21] : memref<8x64x128xf32, #tpu.memory_space<vmem>>, vector<1x64x128xf32>
    %18 = vector.shape_cast %17 : vector<1x64x128xf32> to vector<64x128xf32>
    %c0_22 = arith.constant 0 : index
    %c0_23 = arith.constant 0 : index
    %c0_24 = arith.constant 0 : index
    %19 = vector.load %arg1[%c0_22, %c0_23, %c0_24] : memref<2x36x64xf32, #tpu.memory_space<vmem>>, vector<1x36x64xf32>
    %20 = vector.shape_cast %19 : vector<1x36x64xf32> to vector<36x64xf32>
    %cst = arith.constant dense<0.000000e+00> : vector<8x64xf32>
    %21 = tpu.matmul %0, %20, %cst {dimension_numbers = #tpu.dot_dimension_numbers<[1], [0], [0], [1], [0, 0, 1, 1], [], []>} : vector<8x36xf32>, vector<36x64xf32>, vector<8x64xf32> -> vector<8x64xf32>
    %22 = vector.broadcast %1 : vector<8x1xf32> to vector<8x64xf32>
    %23 = arith.addf %21, %22 : vector<8x64xf32>
    %cst_25 = arith.constant 0.000000e+00 : f32
    %24 = vector.broadcast %cst_25 : f32 to vector<8x64xf32>
    %25 = arith.maximumf %23, %24 : vector<8x64xf32>
    %26 = vector.extract_strided_slice %25 {offsets = [0, 0], sizes = [1, 64], strides = [1, 1]} : vector<8x64xf32> to vector<1x64xf32>
    %cst_26 = arith.constant dense<0.000000e+00> : vector<1x128xf32>
    %27 = tpu.matmul %26, %4, %cst_26 {dimension_numbers = #tpu.dot_dimension_numbers<[1], [0], [0], [1], [0, 0, 1, 1], [], []>} : vector<1x64xf32>, vector<64x128xf32>, vector<1x128xf32> -> vector<1x128xf32>
    %28 = arith.addf %2, %27 : vector<1x128xf32>
    %29 = vector.extract_strided_slice %25 {offsets = [1, 0], sizes = [1, 64], strides = [1, 1]} : vector<8x64xf32> to vector<1x64xf32>
    %cst_27 = arith.constant dense<0.000000e+00> : vector<1x128xf32>
    %30 = tpu.matmul %29, %6, %cst_27 {dimension_numbers = #tpu.dot_dimension_numbers<[1], [0], [0], [1], [0, 0, 1, 1], [], []>} : vector<1x64xf32>, vector<64x128xf32>, vector<1x128xf32> -> vector<1x128xf32>
    %31 = arith.addf %28, %30 : vector<1x128xf32>
    %32 = vector.extract_strided_slice %25 {offsets = [2, 0], sizes = [1, 64], strides = [1, 1]} : vector<8x64xf32> to vector<1x64xf32>
    %cst_28 = arith.constant dense<0.000000e+00> : vector<1x128xf32>
    %33 = tpu.matmul %32, %8, %cst_28 {dimension_numbers = #tpu.dot_dimension_numbers<[1], [0], [0], [1], [0, 0, 1, 1], [], []>} : vector<1x64xf32>, vector<64x128xf32>, vector<1x128xf32> -> vector<1x128xf32>
    %34 = arith.addf %31, %33 : vector<1x128xf32>
    %35 = vector.extract_strided_slice %25 {offsets = [3, 0], sizes = [1, 64], strides = [1, 1]} : vector<8x64xf32> to vector<1x64xf32>
    %cst_29 = arith.constant dense<0.000000e+00> : vector<1x128xf32>
    %36 = tpu.matmul %35, %10, %cst_29 {dimension_numbers = #tpu.dot_dimension_numbers<[1], [0], [0], [1], [0, 0, 1, 1], [], []>} : vector<1x64xf32>, vector<64x128xf32>, vector<1x128xf32> -> vector<1x128xf32>
    %37 = arith.addf %34, %36 : vector<1x128xf32>
    %38 = vector.extract_strided_slice %25 {offsets = [4, 0], sizes = [1, 64], strides = [1, 1]} : vector<8x64xf32> to vector<1x64xf32>
    %cst_30 = arith.constant dense<0.000000e+00> : vector<1x128xf32>
    %39 = tpu.matmul %38, %12, %cst_30 {dimension_numbers = #tpu.dot_dimension_numbers<[1], [0], [0], [1], [0, 0, 1, 1], [], []>} : vector<1x64xf32>, vector<64x128xf32>, vector<1x128xf32> -> vector<1x128xf32>
    %40 = arith.addf %37, %39 : vector<1x128xf32>
    %41 = vector.extract_strided_slice %25 {offsets = [5, 0], sizes = [1, 64], strides = [1, 1]} : vector<8x64xf32> to vector<1x64xf32>
    %cst_31 = arith.constant dense<0.000000e+00> : vector<1x128xf32>
    %42 = tpu.matmul %41, %14, %cst_31 {dimension_numbers = #tpu.dot_dimension_numbers<[1], [0], [0], [1], [0, 0, 1, 1], [], []>} : vector<1x64xf32>, vector<64x128xf32>, vector<1x128xf32> -> vector<1x128xf32>
    %43 = arith.addf %40, %42 : vector<1x128xf32>
    %44 = vector.extract_strided_slice %25 {offsets = [6, 0], sizes = [1, 64], strides = [1, 1]} : vector<8x64xf32> to vector<1x64xf32>
    %cst_32 = arith.constant dense<0.000000e+00> : vector<1x128xf32>
    %45 = tpu.matmul %44, %16, %cst_32 {dimension_numbers = #tpu.dot_dimension_numbers<[1], [0], [0], [1], [0, 0, 1, 1], [], []>} : vector<1x64xf32>, vector<64x128xf32>, vector<1x128xf32> -> vector<1x128xf32>
    %46 = arith.addf %43, %45 : vector<1x128xf32>
    %47 = vector.extract_strided_slice %25 {offsets = [7, 0], sizes = [1, 64], strides = [1, 1]} : vector<8x64xf32> to vector<1x64xf32>
    %cst_33 = arith.constant dense<0.000000e+00> : vector<1x128xf32>
    %48 = tpu.matmul %47, %18, %cst_33 {dimension_numbers = #tpu.dot_dimension_numbers<[1], [0], [0], [1], [0, 0, 1, 1], [], []>} : vector<1x64xf32>, vector<64x128xf32>, vector<1x128xf32> -> vector<1x128xf32>
    %49 = arith.addf %46, %48 : vector<1x128xf32>
    %c1_34 = arith.constant 1 : index
    %c0_35 = arith.constant 0 : index
    %c0_36 = arith.constant 0 : index
    %50 = vector.load %arg1[%c1_34, %c0_35, %c0_36] : memref<2x36x64xf32, #tpu.memory_space<vmem>>, vector<1x36x64xf32>
    %51 = vector.shape_cast %50 : vector<1x36x64xf32> to vector<36x64xf32>
    %cst_37 = arith.constant dense<0.000000e+00> : vector<8x64xf32>
    %52 = tpu.matmul %0, %51, %cst_37 {dimension_numbers = #tpu.dot_dimension_numbers<[1], [0], [0], [1], [0, 0, 1, 1], [], []>} : vector<8x36xf32>, vector<36x64xf32>, vector<8x64xf32> -> vector<8x64xf32>
    %53 = vector.broadcast %1 : vector<8x1xf32> to vector<8x64xf32>
    %54 = arith.addf %52, %53 : vector<8x64xf32>
    %cst_38 = arith.constant 0.000000e+00 : f32
    %55 = vector.broadcast %cst_38 : f32 to vector<8x64xf32>
    %56 = arith.maximumf %54, %55 : vector<8x64xf32>
    %57 = vector.extract_strided_slice %56 {offsets = [0, 0], sizes = [1, 64], strides = [1, 1]} : vector<8x64xf32> to vector<1x64xf32>
    %cst_39 = arith.constant dense<0.000000e+00> : vector<1x128xf32>
    %58 = tpu.matmul %57, %4, %cst_39 {dimension_numbers = #tpu.dot_dimension_numbers<[1], [0], [0], [1], [0, 0, 1, 1], [], []>} : vector<1x64xf32>, vector<64x128xf32>, vector<1x128xf32> -> vector<1x128xf32>
    %59 = arith.addf %2, %58 : vector<1x128xf32>
    %60 = vector.extract_strided_slice %56 {offsets = [1, 0], sizes = [1, 64], strides = [1, 1]} : vector<8x64xf32> to vector<1x64xf32>
    %cst_40 = arith.constant dense<0.000000e+00> : vector<1x128xf32>
    %61 = tpu.matmul %60, %6, %cst_40 {dimension_numbers = #tpu.dot_dimension_numbers<[1], [0], [0], [1], [0, 0, 1, 1], [], []>} : vector<1x64xf32>, vector<64x128xf32>, vector<1x128xf32> -> vector<1x128xf32>
    %62 = arith.addf %59, %61 : vector<1x128xf32>
    %63 = vector.extract_strided_slice %56 {offsets = [2, 0], sizes = [1, 64], strides = [1, 1]} : vector<8x64xf32> to vector<1x64xf32>
    %cst_41 = arith.constant dense<0.000000e+00> : vector<1x128xf32>
    %64 = tpu.matmul %63, %8, %cst_41 {dimension_numbers = #tpu.dot_dimension_numbers<[1], [0], [0], [1], [0, 0, 1, 1], [], []>} : vector<1x64xf32>, vector<64x128xf32>, vector<1x128xf32> -> vector<1x128xf32>
    %65 = arith.addf %62, %64 : vector<1x128xf32>
    %66 = vector.extract_strided_slice %56 {offsets = [3, 0], sizes = [1, 64], strides = [1, 1]} : vector<8x64xf32> to vector<1x64xf32>
    %cst_42 = arith.constant dense<0.000000e+00> : vector<1x128xf32>
    %67 = tpu.matmul %66, %10, %cst_42 {dimension_numbers = #tpu.dot_dimension_numbers<[1], [0], [0], [1], [0, 0, 1, 1], [], []>} : vector<1x64xf32>, vector<64x128xf32>, vector<1x128xf32> -> vector<1x128xf32>
    %68 = arith.addf %65, %67 : vector<1x128xf32>
    %69 = vector.extract_strided_slice %56 {offsets = [4, 0], sizes = [1, 64], strides = [1, 1]} : vector<8x64xf32> to vector<1x64xf32>
    %cst_43 = arith.constant dense<0.000000e+00> : vector<1x128xf32>
    %70 = tpu.matmul %69, %12, %cst_43 {dimension_numbers = #tpu.dot_dimension_numbers<[1], [0], [0], [1], [0, 0, 1, 1], [], []>} : vector<1x64xf32>, vector<64x128xf32>, vector<1x128xf32> -> vector<1x128xf32>
    %71 = arith.addf %68, %70 : vector<1x128xf32>
    %72 = vector.extract_strided_slice %56 {offsets = [5, 0], sizes = [1, 64], strides = [1, 1]} : vector<8x64xf32> to vector<1x64xf32>
    %cst_44 = arith.constant dense<0.000000e+00> : vector<1x128xf32>
    %73 = tpu.matmul %72, %14, %cst_44 {dimension_numbers = #tpu.dot_dimension_numbers<[1], [0], [0], [1], [0, 0, 1, 1], [], []>} : vector<1x64xf32>, vector<64x128xf32>, vector<1x128xf32> -> vector<1x128xf32>
    %74 = arith.addf %71, %73 : vector<1x128xf32>
    %75 = vector.extract_strided_slice %56 {offsets = [6, 0], sizes = [1, 64], strides = [1, 1]} : vector<8x64xf32> to vector<1x64xf32>
    %cst_45 = arith.constant dense<0.000000e+00> : vector<1x128xf32>
    %76 = tpu.matmul %75, %16, %cst_45 {dimension_numbers = #tpu.dot_dimension_numbers<[1], [0], [0], [1], [0, 0, 1, 1], [], []>} : vector<1x64xf32>, vector<64x128xf32>, vector<1x128xf32> -> vector<1x128xf32>
    %77 = arith.addf %74, %76 : vector<1x128xf32>
    %78 = vector.extract_strided_slice %56 {offsets = [7, 0], sizes = [1, 64], strides = [1, 1]} : vector<8x64xf32> to vector<1x64xf32>
    %cst_46 = arith.constant dense<0.000000e+00> : vector<1x128xf32>
    %79 = tpu.matmul %78, %18, %cst_46 {dimension_numbers = #tpu.dot_dimension_numbers<[1], [0], [0], [1], [0, 0, 1, 1], [], []>} : vector<1x64xf32>, vector<64x128xf32>, vector<1x128xf32> -> vector<1x128xf32>
    %80 = arith.addf %77, %79 : vector<1x128xf32>
    %81 = tpu.concatenate %49, %80 in 0 : vector<1x128xf32>, vector<1x128xf32> -> vector<2x128xf32>
    %c0_47 = arith.constant 0 : index
    %c0_48 = arith.constant 0 : index
    %82 = vector.load %arg6[%c0_47, %c0_48] : memref<128x768xf32, #tpu.memory_space<vmem>>, vector<128x768xf32>
    %cst_49 = arith.constant dense<0.000000e+00> : vector<2x768xf32>
    %83 = tpu.matmul %81, %82, %cst_49 {dimension_numbers = #tpu.dot_dimension_numbers<[1], [0], [0], [1], [0, 0, 1, 1], [], []>} : vector<2x128xf32>, vector<128x768xf32>, vector<2x768xf32> -> vector<2x768xf32>
    %84 = vector.extract_strided_slice %83 {offsets = [0, 640], sizes = [1, 128], strides = [1, 1]} : vector<2x768xf32> to vector<1x128xf32>
    %c0_50 = arith.constant 0 : index
    %c0_51 = arith.constant 0 : index
    %85 = memref.load %arg0[%c0_50, %c0_51] : memref<2x5xf32, #tpu.memory_space<smem>>
    %86 = vector.extract_strided_slice %83 {offsets = [0, 0], sizes = [1, 128], strides = [1, 1]} : vector<2x768xf32> to vector<1x128xf32>
    %87 = vector.broadcast %85 : f32 to vector<1x128xf32>
    %88 = arith.mulf %87, %86 : vector<1x128xf32>
    %89 = arith.addf %84, %88 : vector<1x128xf32>
    %c0_52 = arith.constant 0 : index
    %c1_53 = arith.constant 1 : index
    %90 = memref.load %arg0[%c0_52, %c1_53] : memref<2x5xf32, #tpu.memory_space<smem>>
    %91 = vector.extract_strided_slice %83 {offsets = [0, 128], sizes = [1, 128], strides = [1, 1]} : vector<2x768xf32> to vector<1x128xf32>
    %92 = vector.broadcast %90 : f32 to vector<1x128xf32>
    %93 = arith.mulf %92, %91 : vector<1x128xf32>
    %94 = arith.addf %89, %93 : vector<1x128xf32>
    %c0_54 = arith.constant 0 : index
    %c2_55 = arith.constant 2 : index
    %95 = memref.load %arg0[%c0_54, %c2_55] : memref<2x5xf32, #tpu.memory_space<smem>>
    %96 = vector.extract_strided_slice %83 {offsets = [0, 256], sizes = [1, 128], strides = [1, 1]} : vector<2x768xf32> to vector<1x128xf32>
    %97 = vector.broadcast %95 : f32 to vector<1x128xf32>
    %98 = arith.mulf %97, %96 : vector<1x128xf32>
    %99 = arith.addf %94, %98 : vector<1x128xf32>
    %c0_56 = arith.constant 0 : index
    %c3_57 = arith.constant 3 : index
    %100 = memref.load %arg0[%c0_56, %c3_57] : memref<2x5xf32, #tpu.memory_space<smem>>
    %101 = vector.extract_strided_slice %83 {offsets = [0, 384], sizes = [1, 128], strides = [1, 1]} : vector<2x768xf32> to vector<1x128xf32>
    %102 = vector.broadcast %100 : f32 to vector<1x128xf32>
    %103 = arith.mulf %102, %101 : vector<1x128xf32>
    %104 = arith.addf %99, %103 : vector<1x128xf32>
    %c0_58 = arith.constant 0 : index
    %c4_59 = arith.constant 4 : index
    %105 = memref.load %arg0[%c0_58, %c4_59] : memref<2x5xf32, #tpu.memory_space<smem>>
    %106 = vector.extract_strided_slice %83 {offsets = [0, 512], sizes = [1, 128], strides = [1, 1]} : vector<2x768xf32> to vector<1x128xf32>
    %107 = vector.broadcast %105 : f32 to vector<1x128xf32>
    %108 = arith.mulf %107, %106 : vector<1x128xf32>
    %109 = arith.addf %104, %108 : vector<1x128xf32>
    %110 = vector.extract_strided_slice %83 {offsets = [1, 640], sizes = [1, 128], strides = [1, 1]} : vector<2x768xf32> to vector<1x128xf32>
    %c1_60 = arith.constant 1 : index
    %c0_61 = arith.constant 0 : index
    %111 = memref.load %arg0[%c1_60, %c0_61] : memref<2x5xf32, #tpu.memory_space<smem>>
    %112 = vector.extract_strided_slice %83 {offsets = [1, 0], sizes = [1, 128], strides = [1, 1]} : vector<2x768xf32> to vector<1x128xf32>
    %113 = vector.broadcast %111 : f32 to vector<1x128xf32>
    %114 = arith.mulf %113, %112 : vector<1x128xf32>
    %115 = arith.addf %110, %114 : vector<1x128xf32>
    %c1_62 = arith.constant 1 : index
    %c1_63 = arith.constant 1 : index
    %116 = memref.load %arg0[%c1_62, %c1_63] : memref<2x5xf32, #tpu.memory_space<smem>>
    %117 = vector.extract_strided_slice %83 {offsets = [1, 128], sizes = [1, 128], strides = [1, 1]} : vector<2x768xf32> to vector<1x128xf32>
    %118 = vector.broadcast %116 : f32 to vector<1x128xf32>
    %119 = arith.mulf %118, %117 : vector<1x128xf32>
    %120 = arith.addf %115, %119 : vector<1x128xf32>
    %c1_64 = arith.constant 1 : index
    %c2_65 = arith.constant 2 : index
    %121 = memref.load %arg0[%c1_64, %c2_65] : memref<2x5xf32, #tpu.memory_space<smem>>
    %122 = vector.extract_strided_slice %83 {offsets = [1, 256], sizes = [1, 128], strides = [1, 1]} : vector<2x768xf32> to vector<1x128xf32>
    %123 = vector.broadcast %121 : f32 to vector<1x128xf32>
    %124 = arith.mulf %123, %122 : vector<1x128xf32>
    %125 = arith.addf %120, %124 : vector<1x128xf32>
    %c1_66 = arith.constant 1 : index
    %c3_67 = arith.constant 3 : index
    %126 = memref.load %arg0[%c1_66, %c3_67] : memref<2x5xf32, #tpu.memory_space<smem>>
    %127 = vector.extract_strided_slice %83 {offsets = [1, 384], sizes = [1, 128], strides = [1, 1]} : vector<2x768xf32> to vector<1x128xf32>
    %128 = vector.broadcast %126 : f32 to vector<1x128xf32>
    %129 = arith.mulf %128, %127 : vector<1x128xf32>
    %130 = arith.addf %125, %129 : vector<1x128xf32>
    %c1_68 = arith.constant 1 : index
    %c4_69 = arith.constant 4 : index
    %131 = memref.load %arg0[%c1_68, %c4_69] : memref<2x5xf32, #tpu.memory_space<smem>>
    %132 = vector.extract_strided_slice %83 {offsets = [1, 512], sizes = [1, 128], strides = [1, 1]} : vector<2x768xf32> to vector<1x128xf32>
    %133 = vector.broadcast %131 : f32 to vector<1x128xf32>
    %134 = arith.mulf %133, %132 : vector<1x128xf32>
    %135 = arith.addf %130, %134 : vector<1x128xf32>
    %136 = tpu.concatenate %109, %135 in 0 : vector<1x128xf32>, vector<1x128xf32> -> vector<2x128xf32>
    %cst_70 = arith.constant dense<0.000000e+00> : vector<128xf32>
    %137 = vector.multi_reduction <add>, %136, %cst_70 [0] : vector<2x128xf32> to vector<128xf32>
    %138 = vector.shape_cast %137 : vector<128xf32> to vector<1x128xf32>
    %cst_71 = arith.constant 2.000000e+00 : f32
    %139 = vector.broadcast %cst_71 : f32 to vector<1x128xf32>
    %140 = arith.divf %138, %139 : vector<1x128xf32>
    %141 = vector.broadcast %140 : vector<1x128xf32> to vector<2x128xf32>
    %142 = arith.subf %136, %141 : vector<2x128xf32>
    %143 = arith.mulf %142, %142 : vector<2x128xf32>
    %cst_72 = arith.constant dense<0.000000e+00> : vector<128xf32>
    %144 = vector.multi_reduction <add>, %143, %cst_72 [0] : vector<2x128xf32> to vector<128xf32>
    %145 = vector.shape_cast %144 : vector<128xf32> to vector<1x128xf32>
    %cst_73 = arith.constant 2.000000e+00 : f32
    %146 = vector.broadcast %cst_73 : f32 to vector<1x128xf32>
    %147 = arith.divf %145, %146 : vector<1x128xf32>
    %148 = vector.broadcast %140 : vector<1x128xf32> to vector<2x128xf32>
    %149 = arith.subf %136, %148 : vector<2x128xf32>
    %cst_74 = arith.constant 9.99999974E-6 : f32
    %150 = vector.broadcast %cst_74 : f32 to vector<1x128xf32>
    %151 = arith.addf %147, %150 : vector<1x128xf32>
    %152 = math.rsqrt %151 : vector<1x128xf32>
    %153 = vector.broadcast %152 : vector<1x128xf32> to vector<2x128xf32>
    %154 = arith.mulf %149, %153 : vector<2x128xf32>
    %c0_75 = arith.constant 0 : index
    %c0_76 = arith.constant 0 : index
    %155 = vector.load %arg7[%c0_75, %c0_76] : memref<1x128xf32, #tpu.memory_space<vmem>>, vector<1x128xf32>
    %156 = vector.broadcast %155 : vector<1x128xf32> to vector<2x128xf32>
    %157 = arith.mulf %154, %156 : vector<2x128xf32>
    %c0_77 = arith.constant 0 : index
    %c0_78 = arith.constant 0 : index
    %158 = vector.load %arg8[%c0_77, %c0_78] : memref<1x128xf32, #tpu.memory_space<vmem>>, vector<1x128xf32>
    %159 = vector.broadcast %158 : vector<1x128xf32> to vector<2x128xf32>
    %160 = arith.addf %157, %159 : vector<2x128xf32>
    %cst_79 = arith.constant 0.000000e+00 : f32
    %161 = vector.broadcast %cst_79 : f32 to vector<2x128xf32>
    %162 = arith.maximumf %160, %161 : vector<2x128xf32>
    %c0_80 = arith.constant 0 : index
    %c0_81 = arith.constant 0 : index
    %163 = vector.load %arg9[%c0_80, %c0_81] : memref<128x2xf32, #tpu.memory_space<vmem>>, vector<128x2xf32>
    %cst_82 = arith.constant dense<0.000000e+00> : vector<2x2xf32>
    %164 = tpu.matmul %162, %163, %cst_82 {dimension_numbers = #tpu.dot_dimension_numbers<[1], [0], [0], [1], [0, 0, 1, 1], [], []>} : vector<2x128xf32>, vector<128x2xf32>, vector<2x2xf32> -> vector<2x2xf32>
    %c0_83 = arith.constant 0 : index
    %c0_84 = arith.constant 0 : index
    %165 = vector.load %arg10[%c0_83, %c0_84] : memref<1x2xf32, #tpu.memory_space<vmem>>, vector<1x2xf32>
    %166 = vector.broadcast %165 : vector<1x2xf32> to vector<2x2xf32>
    %167 = arith.addf %164, %166 : vector<2x2xf32>
    %c0_85 = arith.constant 0 : index
    %c0_86 = arith.constant 0 : index
    %168 = vector.load %arg11[%c0_85, %c0_86] : memref<2x2xf32, #tpu.memory_space<vmem>>, vector<2x2xf32>
    tpu.vector_store %arg11[%c0_85, %c0_86], %167 {strides = array<i32>} : memref<2x2xf32, #tpu.memory_space<vmem>>, vector<2x2xf32>,
    return
  }
}

</mosaic_0001>

<bundles_post_ra>
// kernel: forward.1
= control target key start
LH: loop header
LB: loop body
LE: loop exit
PB: predicated region body
PF: predicated region fallthrough
CT: control target
= control target key end

     0   :  { %16 = vsyncpa [#allocation4], 0  ;;  %s3826_s0 = inlined_call_operand.vmem [shape: f32[2,5], index: 0, kind: input, shape index: {}]   ;;  %s3827_s1 = inlined_call_operand.vmem [shape: f32[2,36,64], index: 1, kind: input, shape index: {}]   ;;  %s3828_s2 = inlined_call_operand.vmem [shape: f32[8,36], index: 2, kind: input, shape index: {}]   ;;  %s3829_s3 = inlined_call_operand.vmem [shape: f32[8,1], index: 3, kind: input, shape index: {}]   ;;  %s3830_s4 = inlined_call_operand.vmem [shape: f32[8,64,128], index: 4, kind: input, shape index: {}]   ;;  %s3831_s5 = inlined_call_operand.vmem [shape: f32[1,128], index: 5, kind: input, shape index: {}]   ;;  %s3832_s6 = inlined_call_operand.vmem [shape: f32[128,768], index: 6, kind: input, shape index: {}]   ;;  %s3833_s7 = inlined_call_operand.vmem [shape: f32[1,128], index: 7, kind: input, shape index: {}]   ;;  %s3834_s8 = inlined_call_operand.vmem [shape: f32[1,128], index: 8, kind: input, shape index: {}]   ;;  %s3835_s9 = inlined_call_operand.vmem [shape: f32[128,2], index: 9, kind: input, shape index: {}]   ;;  %s3836_s10 = inlined_call_operand.vmem [shape: f32[1,2], index: 10, kind: input, shape index: {}]   ;;  %s3837_s11 = inlined_call_operand.hbm [shape: f32[2,2], index: 11, kind: output, shape index: {}]  }
   0x1   :  { %17 = vsyncpa [#allocation3], 0  ;;  %s24_s19 = sshll.u32 %s3826_s0, 4  ;;  %s25_s19 = int_to_ptr.vmem [resolvable:$true] %s24_s19 }
   0x2   :  { %s2627_s20 = scalar_lea.vmem %s25_s19, 32  ;;  %p2632_p1 = scmp.lt.s32.totalorder %s25_s19, %s25_s19 }
   0x3   :  { %p2628_p0 = scmp.ne.s32.totalorder %s25_s19, %s2627_s20  ;;  %p2633_p2 = scmp.lt.s32.totalorder %s2627_s20, %s2627_s20 }
   0x5   :  { %p2634_p3 = por %p2633_p2, %p2632_p1 }
   0x7   :  { %p2635_p4 = pnand %p2634_p3, %p2628_p0 }
   0x9   :  { %2638 = shalt.err (!%p2635_p4)
}
   0xa   :  { %s2663_s21 = smov [#allocation2]  }
   0xb   :  { %27 = dma.vmem_to_smem %s25_s19, 32, %s2663_s21, [#allocation4]  }
   0xc   :  { %2659 = dma.done.wait [#allocation4], 32  }
   0xd   :  { %2660 = vsyncadd [#allocation4], 4294967264 }
   0xe   :  { %51 = sfence }
   0xf   :  { %v130_v0 = vld [vmem:[%s3827_s1 + $0x20] sm:$0xf]  ;;  %vm140_vm0 = vcmask 1043456   ;;  %v2664_v1 = vmov 0.0   ;;  %v129_v2 = vld [vmem:[%s3827_s1 + $0x18] sm:$0xff]  ;;  %vm2665_vm1 = vmmov 0  }
  0x10   :  { %2254 = vmatprep.subr.mxu0 %v2664_v1  ;;  %2267 = vmatprep.subr.mxu1 %v2664_v1  ;;  %v53_v3 = vld [vmem:[%s3829_s3] sm:$0xff]  ;;  %v2748_v4 = vld [vmem:[%s3830_s4 + $0x38] sm:$0xff]  ;;  %v128_v5 = vld [vmem:[%s3827_s1 + $0x10] sm:$0xff]  ;;  %v2666_v6 = vmov 0   ;;  %vm136_vm2 = vcmask 293888   ;;  %vm215_vm3 = vcmask 523264  }
  0x11   :  { %2255 = vmatpush3.msk.msra.mxu0 %vm140_vm0, %v130_v0  ;;  %2264 = vmatprep.mubr.msk.f32.mxu0 %vm2665_vm1, %v2664_v1  ;;  %v2757_v7 = vld [vmem:[%s3830_s4 + $0x30] sm:$0xff]  ;;  %v127_v8 = vld [vmem:[%s3827_s1 + $0x8] sm:$0xff]  ;;  %v126_v10 = vld [vmem:[%s3827_s1] sm:$0xff]  ;;  %vm1486_vm4 = vcmask 1040384   ;;  %s2069_s20 = sld [smem:[#allocation2 + $0x1]]  ;;  %vm1838_vm5 = vcmask 1041408  }
  0x12   :  { %2256 = vmatprep.subr.mxu0 %v2664_v1  ;;  %2624 = vset.pattern.permute.xlu0 %v2666_v6  ;;  %v2768_v9 = vld [vmem:[%s3830_s4 + $0x28] sm:$0xff]  ;;  %v2778_v11 = vld [vmem:[%s3828_s2] sm:$0xff]  ;;  %v2785_v12 = vld [vmem:[%s3830_s4 + $0x78] sm:$0xff]  ;;  %s2070_s21 = sld [smem:[#allocation2 + $0x2]]  ;;  %s2667_s30 = smov [#allocation5]   ;;  %vm1971_vm6 = vcmask 9216  }
  0x13   :  { %2257 = vmatpush3.msra.mxu0 %v129_v2  ;;  %133 = vperm.xlu0 %2624, %v53_v3   ;;  %v2791_v13 = vld [vmem:[%s3830_s4 + $0x20] sm:$0xff]  ;;  %v2800_v14 = vld [vmem:[%s3830_s4 + $0x70] sm:$0xff]  ;;  %v2805_v15 = vld [vmem:[%s3830_s4 + $0x18] sm:$0xff]  ;;  %s2075_s22 = sld [smem:[#allocation2 + $0x82]]  ;;  %s1979_s12 = sshll.u32 %s2667_s30, 4  ;;  %s1980_s12 = int_to_ptr.vmem [resolvable:$true] %s1979_s12 }
  0x14   :  { %2258 = vmatprep.subr.mxu0 %v2664_v1  ;;  %2268 = vmatpush3.msra.mxu1 %v2748_v4  ;;  %v2813_v16 = vld [vmem:[%s3830_s4 + $0x68] sm:$0xff]  ;;  %v2819_v17 = vld [vmem:[%s3830_s4 + $0x10] sm:$0xff]  ;;  %v2827_v18 = vld [vmem:[%s3830_s4 + $0x60] sm:$0xff]  ;;  %s2071_s23 = sld [smem:[#allocation2 + $0x3]]  ;;  %p2644_p6 = scmp.lt.s32.totalorder %s1980_s12, %s1980_s12 }
  0x15   :  { %2259 = vmatpush3.msra.mxu0 %v128_v5  ;;  %2269 = vmatprep.subr.mxu1 %v2664_v1  ;;  %v2836_v19 = vld [vmem:[%s3830_s4 + $0x58] sm:$0xff]  ;;  %v2850_v20 = vld [vmem:[%s3830_s4 + $0x8] sm:$0xff]  ;;  %v2855_v21 = vld [vmem:[%s3830_s4 + $0x50] sm:$0xff]  ;;  %s2076_s0 = sld [smem:[#allocation2 + $0x83]] }
  0x16   :  { %2260 = vmatprep.subr.mxu0 %v2664_v1  ;;  %2270 = vmatpush3.msra.mxu1 %v2757_v7  ;;  %v2864_v22 = vld [vmem:[%s3830_s4] sm:$0xff]  ;;  %v2869_v23 = vld [vmem:[%s3830_s4 + $0x48] sm:$0xff]  ;;  %v2890_v30 = vld [vmem:[%s3830_s4 + $0xb8] sm:$0xff]  ;;  %s3810_s2 = sld [smem:[#allocation2 + $0x4]] }
  0x17   :  { %2261 = vmatpush3.msra.mxu0 %v127_v8  ;;  %2271 = vmatprep.subr.mxu1 %v2664_v1  ;;  %v2878_v24 = vld [vmem:[%s3830_s4 + $0x40] sm:$0xff]  ;;  %v2898_v32 = vld [vmem:[%s3830_s4 + $0xb0] sm:$0xff]  ;;  %v2903_v33 = vld [vmem:[%s3830_s4 + $0xf8] sm:$0xff]  ;;  %s2077_s24 = sld [smem:[#allocation2 + $0x84]] }
  0x18   :  { %2262 = vmatprep.subr.mxu0 %v2664_v1  ;;  %2272 = vmatpush3.msra.mxu1 %v2768_v9  ;;  %v2913_v34 = vld [vmem:[%s3830_s4 + $0xa8] sm:$0xff]  ;;  %v2918_v35 = vld [vmem:[%s3830_s4 + $0xf0] sm:$0xff]  ;;  %v2927_v36 = vld [vmem:[%s3830_s4 + $0xa0] sm:$0xff] }
  0x19   :  { %2263 = vmatpush3.msra.mxu0 %v126_v10  ;;  %2273 = vmatprep.subr.mxu1 %v2664_v1  ;;  %v2932_v37 = vld [vmem:[%s3830_s4 + $0xe8] sm:$0xff]  ;;  %v2941_v38 = vld [vmem:[%s3830_s4 + $0x98] sm:$0xff]  ;;  %v2946_v39 = vld [vmem:[%s3830_s4 + $0xe0] sm:$0xff] }
  0x1a   :  { %2265 = vmatmul.mubr.msk.f32.vlgmr.msra.gmra.mxu0 %vm136_vm2, %v2778_v11  ;;  %2286 = vmatprep.subr.mxu0 %v2664_v1  ;;  %v2955_v40 = vld [vmem:[%s3830_s4 + $0x90] sm:$0xff]  ;;  %v2960_v41 = vld [vmem:[%s3830_s4 + $0xd8] sm:$0xff]  ;;  %v2969_v42 = vld [vmem:[%s3830_s4 + $0x88] sm:$0xff] }
  0x1b   :  { %2287 = vmatpush3.msra.mxu0 %v2785_v12  ;;  %2274 = vmatpush3.msra.mxu1 %v2791_v13  ;;  %v2974_v43 = vld [vmem:[%s3830_s4 + $0xd0] sm:$0xff]  ;;  %v2983_v44 = vld [vmem:[%s3830_s4 + $0x80] sm:$0xff]  ;;  %v2988_v45 = vld [vmem:[%s3830_s4 + $0xc8] sm:$0xff] }
  0x1c   :  { %2288 = vmatprep.subr.mxu0 %v2664_v1  ;;  %2275 = vmatprep.subr.mxu1 %v2664_v1  ;;  %v2998_v47 = vld [vmem:[%s3830_s4 + $0xc0] sm:$0xff]  ;;  %v3005_v48 = vld [vmem:[%s3830_s4 + $0x138] sm:$0xff]  ;;  %v3015_v50 = vld [vmem:[%s3830_s4 + $0x130] sm:$0xff] }
  0x1d   :  { %2289 = vmatpush3.msra.mxu0 %v2800_v14  ;;  %2276 = vmatpush3.msra.mxu1 %v2805_v15  ;;  %v3023_v51 = vld [vmem:[%s3830_s4 + $0x178] sm:$0xff]  ;;  %v3030_v52 = vld [vmem:[%s3830_s4 + $0x128] sm:$0xff]  ;;  %v3037_v53 = vld [vmem:[%s3830_s4 + $0x170] sm:$0xff] }
  0x1e   :  { %2290 = vmatprep.subr.mxu0 %v2664_v1  ;;  %2277 = vmatprep.subr.mxu1 %v2664_v1  ;;  %v3044_v54 = vld [vmem:[%s3830_s4 + $0x120] sm:$0xff]  ;;  %v3051_v55 = vld [vmem:[%s3830_s4 + $0x168] sm:$0xff]  ;;  %v3058_v56 = vld [vmem:[%s3830_s4 + $0x118] sm:$0xff] }
  0x1f   :  { %2291 = vmatpush3.msra.mxu0 %v2813_v16  ;;  %2278 = vmatpush3.msra.mxu1 %v2819_v17  ;;  %v3065_v57 = vld [vmem:[%s3830_s4 + $0x160] sm:$0xff]  ;;  %v3072_v58 = vld [vmem:[%s3830_s4 + $0x110] sm:$0xff]  ;;  %v3079_v59 = vld [vmem:[%s3830_s4 + $0x158] sm:$0xff] }
  0x20   :  { %2292 = vmatprep.subr.mxu0 %v2664_v1  ;;  %2279 = vmatprep.subr.mxu1 %v2664_v1  ;;  %v3086_v60 = vld [vmem:[%s3830_s4 + $0x108] sm:$0xff]  ;;  %v3093_v61 = vld [vmem:[%s3830_s4 + $0x150] sm:$0xff]  ;;  %v3100_v62 = vld [vmem:[%s3830_s4 + $0x100] sm:$0xff] }
  0x21   :  { %2293 = vmatpush3.msra.mxu0 %v2827_v18  ;;  %2283 = vmatprep.mubr.msk.f32.mxu1 %vm2665_vm1, %v2664_v1  ;;  %v3107_v63 = vld [vmem:[%s3830_s4 + $0x148] sm:$0xff]  ;;  %v3117_v2 = vld [vmem:[%s3830_s4 + $0x140] sm:$0xff]  ;;  %v3125_v3 = vld [vmem:[%s3830_s4 + $0x1b8] sm:$0xff] }
  0x22   :  { %2294 = vmatprep.subr.mxu0 %v2664_v1  ;;  %2302 = vmatprep.mubr.msk.f32.mxu0 %vm2665_vm1, %v2664_v1  ;;  %v3135_v6 = vld [vmem:[%s3830_s4 + $0x1b0] sm:$0xff]  ;;  %v3143_v8 = vld [vmem:[%s3830_s4 + $0x1f8] sm:$0xff]  ;;  %v3150_v10 = vld [vmem:[%s3830_s4 + $0x1a8] sm:$0xff] }
  0x23   :  { %2295 = vmatpush3.msra.mxu0 %v2836_v19  ;;  %2280 = vmatpush3.msra.mxu1 %v2850_v20 }
  0x24   :  { %2296 = vmatprep.subr.mxu0 %v2664_v1  ;;  %2281 = vmatprep.subr.mxu1 %v2664_v1 }
  0x25   :  { %2297 = vmatpush3.msra.mxu0 %v2855_v21  ;;  %2282 = vmatpush3.msra.mxu1 %v2864_v22 }
  0x26   :  { %2298 = vmatprep.subr.mxu0 %v2664_v1  ;;  %2305 = vmatprep.subr.mxu1 %v2664_v1 }
  0x27   :  { %2299 = vmatpush3.msra.mxu0 %v2869_v23 }
  0x28   :  { %2300 = vmatprep.subr.mxu0 %v2664_v1 }
  0x29   :  { %2301 = vmatpush3.msra.mxu0 %v2878_v24 }
  0x2a   :  { %2324 = vmatprep.subr.mxu0 %v2664_v1 }
  0x8e   :  { %v2882_v25 = vpop.permute.xlu0 %133 }
  0xda   :  { %v210_v26 = vpop.f32.mrf.mxu0 }
  0xdb   :  { %v211_v27 = vadd.f32 %v210_v26, %v2882_v25  ;;  %v3157_v26 = vld [vmem:[%s3830_s4 + $0x1f0] sm:$0xff] }
  0xdc   :  { %v2266_v28 = vpop.f32.mrf.mxu0 }
  0xdd   :  { %v2885_v29 = vmax.f32 %v211_v27, 0.0  ;;  %v3164_v27 = vld [vmem:[%s3830_s4 + $0x1a0] sm:$0xff]  ;;  %v3171_v28 = vld [vmem:[%s3830_s4 + $0x1e8] sm:$0xff] }
  0xde   :  { %3846 = vst [vmem:[#allocation8_spill] sm:$0xff] %v3171_v28 }
  0xdf   :  { %2284 = vmatmul.mubr.msk.f32.vlgmr.msra.gmra.mxu1 %vm215_vm3, %v2885_v29  ;;  %v290_v31 = vrot.slane %v2885_v29, 1  ;;  %v364_v46 = vrot.slane %v2885_v29, 2  ;;  %v438_v49 = vrot.slane %v2885_v29, 3  ;;  %v512_v0 = vrot.slane %v2885_v29, 4 }
  0xe0   :  { %2306 = vmatpush3.msra.mxu1 %v2890_v30  ;;  %2321 = vmatprep.mubr.msk.f32.mxu1 %vm2665_vm1, %v2664_v1  ;;  %v586_v5 = vrot.slane %v2885_v29, 5 }
  0xe1   :  { %2307 = vmatprep.subr.mxu1 %v2664_v1  ;;  %2303 = vmatmul.mubr.msk.f32.vlgmr.msra.gmra.mxu0 %vm215_vm3, %v290_v31  ;;  %v3178_v31 = vld [vmem:[%s3830_s4 + $0x198] sm:$0xff] }
  0xe2   :  { %2308 = vmatpush3.msra.mxu1 %v2898_v32  ;;  %2325 = vmatpush3.msra.mxu0 %v2903_v33  ;;  %3847 = vst [vmem:[#allocation9_spill] sm:$0xff] %v3178_v31 }
  0xe3   :  { %2309 = vmatprep.subr.mxu1 %v2664_v1  ;;  %2326 = vmatprep.subr.mxu0 %v2664_v1 }
  0xe4   :  { %2310 = vmatpush3.msra.mxu1 %v2913_v34  ;;  %2327 = vmatpush3.msra.mxu0 %v2918_v35 }
  0xe5   :  { %2311 = vmatprep.subr.mxu1 %v2664_v1  ;;  %2328 = vmatprep.subr.mxu0 %v2664_v1 }
  0xe6   :  { %2312 = vmatpush3.msra.mxu1 %v2927_v36  ;;  %2329 = vmatpush3.msra.mxu0 %v2932_v37 }
  0xe7   :  { %2313 = vmatprep.subr.mxu1 %v2664_v1  ;;  %2330 = vmatprep.subr.mxu0 %v2664_v1 }
  0xe8   :  { %2314 = vmatpush3.msra.mxu1 %v2941_v38  ;;  %2331 = vmatpush3.msra.mxu0 %v2946_v39 }
  0xe9   :  { %2315 = vmatprep.subr.mxu1 %v2664_v1  ;;  %2332 = vmatprep.subr.mxu0 %v2664_v1 }
  0xea   :  { %2316 = vmatpush3.msra.mxu1 %v2955_v40  ;;  %2333 = vmatpush3.msra.mxu0 %v2960_v41 }
  0xeb   :  { %2317 = vmatprep.subr.mxu1 %v2664_v1  ;;  %2334 = vmatprep.subr.mxu0 %v2664_v1 }
  0xec   :  { %2318 = vmatpush3.msra.mxu1 %v2969_v42  ;;  %2335 = vmatpush3.msra.mxu0 %v2974_v43 }
  0xed   :  { %2319 = vmatprep.subr.mxu1 %v2664_v1  ;;  %2336 = vmatprep.subr.mxu0 %v2664_v1 }
  0xee   :  { %2320 = vmatpush3.msra.mxu1 %v2983_v44  ;;  %2337 = vmatpush3.msra.mxu0 %v2988_v45 }
  0xef   :  { %2322 = vmatmul.mubr.msk.f32.vlgmr.msra.gmra.mxu1 %vm215_vm3, %v364_v46  ;;  %2338 = vmatprep.subr.mxu0 %v2664_v1  ;;  %v3185_v46 = vld [vmem:[%s3830_s4 + $0x1e0] sm:$0xff] }
  0xf0   :  { %2343 = vmatprep.subr.mxu1 %v2664_v1  ;;  %2339 = vmatpush3.msra.mxu0 %v2998_v47  ;;  %3848 = vst [vmem:[#allocation10_spill] sm:$0xff] %v3185_v46 }
  0xf1   :  { %2340 = vmatprep.mubr.msk.f32.mxu0 %vm2665_vm1, %v2664_v1  ;;  %2344 = vmatpush3.msra.mxu1 %v3005_v48 }
  0xf2   :  { %2341 = vmatmul.mubr.msk.f32.vlgmr.msra.gmra.mxu0 %vm215_vm3, %v438_v49  ;;  %2345 = vmatprep.subr.mxu1 %v2664_v1  ;;  %v3192_v49 = vld [vmem:[%s3830_s4 + $0x190] sm:$0xff] }
  0xf3   :  { %2362 = vmatprep.subr.mxu0 %v2664_v1  ;;  %2346 = vmatpush3.msra.mxu1 %v3015_v50  ;;  %3849 = vst [vmem:[#allocation11_spill] sm:$0xff] %v3192_v49 }
  0xf4   :  { %2363 = vmatpush3.msra.mxu0 %v3023_v51  ;;  %2347 = vmatprep.subr.mxu1 %v2664_v1 }
  0xf5   :  { %2364 = vmatprep.subr.mxu0 %v2664_v1  ;;  %2348 = vmatpush3.msra.mxu1 %v3030_v52 }
  0xf6   :  { %2365 = vmatpush3.msra.mxu0 %v3037_v53  ;;  %2349 = vmatprep.subr.mxu1 %v2664_v1 }
  0xf7   :  { %2366 = vmatprep.subr.mxu0 %v2664_v1  ;;  %2350 = vmatpush3.msra.mxu1 %v3044_v54 }
  0xf8   :  { %2367 = vmatpush3.msra.mxu0 %v3051_v55  ;;  %2351 = vmatprep.subr.mxu1 %v2664_v1 }
  0xf9   :  { %2368 = vmatprep.subr.mxu0 %v2664_v1  ;;  %2352 = vmatpush3.msra.mxu1 %v3058_v56 }
  0xfa   :  { %2369 = vmatpush3.msra.mxu0 %v3065_v57  ;;  %2353 = vmatprep.subr.mxu1 %v2664_v1 }
  0xfb   :  { %2370 = vmatprep.subr.mxu0 %v2664_v1  ;;  %2354 = vmatpush3.msra.mxu1 %v3072_v58 }
  0xfc   :  { %2371 = vmatpush3.msra.mxu0 %v3079_v59  ;;  %2355 = vmatprep.subr.mxu1 %v2664_v1 }
  0xfd   :  { %2372 = vmatprep.subr.mxu0 %v2664_v1  ;;  %2356 = vmatpush3.msra.mxu1 %v3086_v60 }
  0xfe   :  { %2373 = vmatpush3.msra.mxu0 %v3093_v61  ;;  %2357 = vmatprep.subr.mxu1 %v2664_v1 }
  0xff   :  { %2374 = vmatprep.subr.mxu0 %v2664_v1  ;;  %2358 = vmatpush3.msra.mxu1 %v3100_v62 }
 0x100   :  { %2359 = vmatprep.mubr.msk.f32.mxu1 %vm2665_vm1, %v2664_v1  ;;  %2375 = vmatpush3.msra.mxu0 %v3107_v63 }
 0x101   :  { %2360 = vmatmul.mubr.msk.f32.vlgmr.msra.gmra.mxu1 %vm215_vm3, %v512_v0  ;;  %2376 = vmatprep.subr.mxu0 %v2664_v1  ;;  %v3199_v0 = vld [vmem:[%s3830_s4 + $0x1d8] sm:$0xff] }
 0x102   :  { %2381 = vmatprep.subr.mxu1 %v2664_v1  ;;  %2377 = vmatpush3.msra.mxu0 %v3117_v2  ;;  %3850 = vst [vmem:[#allocation12_spill] sm:$0xff] %v3199_v0 }
 0x103   :  { %2378 = vmatprep.mubr.msk.f32.mxu0 %vm2665_vm1, %v2664_v1  ;;  %2382 = vmatpush3.msra.mxu1 %v3125_v3 }
 0x104   :  { %2379 = vmatmul.mubr.msk.f32.vlgmr.msra.gmra.mxu0 %vm215_vm3, %v586_v5  ;;  %2383 = vmatprep.subr.mxu1 %v2664_v1  ;;  %v3206_v5 = vld [vmem:[%s3830_s4 + $0x188] sm:$0xff] }
 0x105   :  { %2400 = vmatprep.subr.mxu0 %v2664_v1  ;;  %2384 = vmatpush3.msra.mxu1 %v3135_v6  ;;  %3851 = vst [vmem:[#allocation13_spill] sm:$0xff] %v3206_v5 }
 0x106   :  { %2401 = vmatpush3.msra.mxu0 %v3143_v8  ;;  %2385 = vmatprep.subr.mxu1 %v2664_v1 }
 0x107   :  { %2402 = vmatprep.subr.mxu0 %v2664_v1  ;;  %2386 = vmatpush3.msra.mxu1 %v3150_v10 }
 0x108   :  { %2403 = vmatpush3.msra.mxu0 %v3157_v26  ;;  %2387 = vmatprep.subr.mxu1 %v2664_v1 }
 0x109   :  { %2404 = vmatprep.subr.mxu0 %v2664_v1  ;;  %2388 = vmatpush3.msra.mxu1 %v3164_v27 }
 0x10a   :  { %2405 = vmatpush3.msra.mxu0 %v3171_v28  ;;  %2389 = vmatprep.subr.mxu1 %v2664_v1  ;;  %v3237_v28 = vld [vmem:[%s3830_s4 + $0x1c0] sm:$0xff] }
 0x10b   :  { %2406 = vmatprep.subr.mxu0 %v2664_v1  ;;  %2390 = vmatpush3.msra.mxu1 %v3178_v31  ;;  %v3213_v31 = vld [vmem:[%s3830_s4 + $0x1d0] sm:$0xff] }
 0x10c   :  { %2407 = vmatpush3.msra.mxu0 %v3185_v46  ;;  %2391 = vmatprep.subr.mxu1 %v2664_v1  ;;  %3852 = vst [vmem:[#allocation14_spill] sm:$0xff] %v3213_v31  ;;  %v3220_v46 = vld [vmem:[%s3830_s4 + $0x180] sm:$0xff] }
 0x10d   :  { %2408 = vmatprep.subr.mxu0 %v2664_v1  ;;  %2392 = vmatpush3.msra.mxu1 %v3192_v49  ;;  %3853 = vst [vmem:[#allocation15_spill] sm:$0xff] %v3220_v46  ;;  %v3227_v49 = vld [vmem:[%s3830_s4 + $0x1c8] sm:$0xff] }
 0x10e   :  { %2409 = vmatpush3.msra.mxu0 %v3199_v0  ;;  %2393 = vmatprep.subr.mxu1 %v2664_v1  ;;  %v660_v0 = vrot.slane %v2885_v29, 6 }
 0x10f   :  { %2410 = vmatprep.subr.mxu0 %v2664_v1  ;;  %2394 = vmatpush3.msra.mxu1 %v3206_v5  ;;  %v2057_v5 = vld [vmem:[%s3827_s1 + $0x40] sm:$0xff] }
 0x110   :  { %2411 = vmatpush3.msra.mxu0 %v3213_v31  ;;  %2395 = vmatprep.subr.mxu1 %v2664_v1  ;;  %v2058_v31 = vld [vmem:[%s3827_s1 + $0x48] sm:$0xf] }
 0x111   :  { %2412 = vmatprep.subr.mxu0 %v2664_v1  ;;  %2396 = vmatpush3.msra.mxu1 %v3220_v46  ;;  %v734_v46 = vrot.slane %v2885_v29, 7  ;;  %v2055_v29 = vld [vmem:[%s3827_s1 + $0x30] sm:$0xff] }
 0x112   :  { %2397 = vmatprep.mubr.msk.f32.mxu1 %vm2665_vm1, %v2664_v1  ;;  %2413 = vmatpush3.msra.mxu0 %v3227_v49 }
 0x113   :  { %2398 = vmatmul.mubr.msk.f32.vlgmr.msra.gmra.mxu1 %vm215_vm3, %v660_v0  ;;  %2414 = vmatprep.subr.mxu0 %v2664_v1  ;;  %v2056_v0 = vld [vmem:[%s3827_s1 + $0x38] sm:$0xff] }
 0x114   :  { %2419 = vmatprep.subr.mxu1 %v2664_v1  ;;  %2415 = vmatpush3.msra.mxu0 %v3237_v28 }
 0x115   :  { %2416 = vmatprep.mubr.msk.f32.mxu0 %vm2665_vm1, %v2664_v1  ;;  %2420 = vmatpush3.msk.msra.mxu1 %vm140_vm0, %v2058_v31  ;;  %v2054_v31 = vld [vmem:[%s3827_s1 + $0x28] sm:$0xff]  ;;  %s2073_s1 = sld [smem:[#allocation2 + $0x80]] }
 0x116   :  { %2417 = vmatmul.mubr.msk.f32.vlgmr.msra.gmra.mxu0 %vm215_vm3, %v734_v46  ;;  %2421 = vmatprep.subr.mxu1 %v2664_v1 }
 0x117   :  { %2422 = vmatpush3.msra.mxu1 %v2057_v5  ;;  %2429 = vmatprep.mubr.msk.f32.mxu1 %vm2665_vm1, %v2664_v1 }
 0x118   :  { %2423 = vmatprep.subr.mxu1 %v2664_v1  ;;  %2432 = vmatprep.subr.mxu0 %v2664_v1 }
 0x119   :  { %2424 = vmatpush3.msra.mxu1 %v2056_v0  ;;  %2433 = vmatpush3.msra.mxu0 %v2748_v4  ;;  %v3315_v4 = vld [vmem:[%s3831_s5] sm:$0x1]  ;;  %s2074_s5 = sld [smem:[#allocation2 + $0x81]] }
 0x11a   :  { %2425 = vmatprep.subr.mxu1 %v2664_v1  ;;  %2434 = vmatprep.subr.mxu0 %v2664_v1 }
 0x11b   :  { %2426 = vmatpush3.msra.mxu1 %v2055_v29  ;;  %2435 = vmatpush3.msra.mxu0 %v2757_v7 }
 0x11c   :  { %2427 = vmatprep.subr.mxu1 %v2664_v1  ;;  %2436 = vmatprep.subr.mxu0 %v2664_v1 }
 0x11d   :  { %2428 = vmatpush3.msra.mxu1 %v2054_v31  ;;  %2437 = vmatpush3.msra.mxu0 %v2768_v9 }
 0x11e   :  { %2430 = vmatmul.mubr.msk.f32.vlgmr.msra.gmra.mxu1 %vm136_vm2, %v2778_v11  ;;  %2451 = vmatprep.subr.mxu1 %v2664_v1 }
 0x11f   :  { %2452 = vmatpush3.msra.mxu1 %v2785_v12  ;;  %2438 = vmatprep.subr.mxu0 %v2664_v1 }
 0x120   :  { %2453 = vmatprep.subr.mxu1 %v2664_v1  ;;  %2439 = vmatpush3.msra.mxu0 %v2791_v13 }
 0x121   :  { %2454 = vmatpush3.msra.mxu1 %v2800_v14  ;;  %2440 = vmatprep.subr.mxu0 %v2664_v1 }
 0x122   :  { %2455 = vmatprep.subr.mxu1 %v2664_v1  ;;  %2441 = vmatpush3.msra.mxu0 %v2805_v15 }
 0x123   :  { %2456 = vmatpush3.msra.mxu1 %v2813_v16  ;;  %2442 = vmatprep.subr.mxu0 %v2664_v1 }
 0x124   :  { %2457 = vmatprep.subr.mxu1 %v2664_v1  ;;  %2443 = vmatpush3.msra.mxu0 %v2819_v17 }
 0x125   :  { %2458 = vmatpush3.msra.mxu1 %v2827_v18  ;;  %2444 = vmatprep.subr.mxu0 %v2664_v1 }
 0x126   :  { %2459 = vmatprep.subr.mxu1 %v2664_v1  ;;  %2445 = vmatpush3.msra.mxu0 %v2850_v20 }
 0x127   :  { %2460 = vmatpush3.msra.mxu1 %v2836_v19  ;;  %2446 = vmatprep.subr.mxu0 %v2664_v1 }
 0x128   :  { %2461 = vmatprep.subr.mxu1 %v2664_v1  ;;  %2447 = vmatpush3.msra.mxu0 %v2864_v22 }
 0x129   :  { %2462 = vmatpush3.msra.mxu1 %v2855_v21  ;;  %2448 = vmatprep.mubr.msk.f32.mxu0 %vm2665_vm1, %v2664_v1 }
 0x12a   :  { %2463 = vmatprep.subr.mxu1 %v2664_v1  ;;  %2470 = vmatprep.subr.mxu0 %v2664_v1 }
 0x12b   :  { %2464 = vmatpush3.msra.mxu1 %v2869_v23  ;;  %2467 = vmatprep.mubr.msk.f32.mxu1 %vm2665_vm1, %v2664_v1 }
 0x12c   :  { %2465 = vmatprep.subr.mxu1 %v2664_v1 }
 0x12d   :  { %2466 = vmatpush3.msra.mxu1 %v2878_v24 }
 0x12e   :  { %2489 = vmatprep.subr.mxu1 %v2664_v1 }
 0x19f   :  { %v285_v7 = vpop.f32.mrf.mxu1 }
 0x1a0   :  { %v289_v9 = vadd.f32 %v285_v7, %v3315_v4 }
 0x1a1   :  { %v2285_v11 = vpop.f32.mrf.mxu1  ;;  %v359_v12 = vpop.f32.mrf.mxu0 }
 0x1a2   :  { %v363_v13 = vadd.f32 %v359_v12, %v289_v9 }
 0x1a3   :  { %v2304_v14 = vpop.f32.mrf.mxu0 }
 0x1af   :  { %v433_v15 = vpop.f32.mrf.mxu1 }
 0x1b0   :  { %v437_v16 = vadd.f32 %v433_v15, %v363_v13 }
 0x1b1   :  { %v2323_v17 = vpop.f32.mrf.mxu1 }
 0x1b2   :  { %v507_v18 = vpop.f32.mrf.mxu0  ;;  %v1537_v17 = vld [vmem:[%s3832_s6 + $0x188] sm:$0xff] }
 0x1b3   :  { %v511_v19 = vadd.f32 %v507_v18, %v437_v16  ;;  %v1544_v18 = vld [vmem:[%s3832_s6 + $0x1c0] sm:$0xff] }
 0x1b4   :  { %v2342_v20 = vpop.f32.mrf.mxu0 }
 0x1b5   :  { %v1539_v20 = vld [vmem:[%s3832_s6 + $0x198] sm:$0xff] }
 0x1c1   :  { %v581_v21 = vpop.f32.mrf.mxu1 }
 0x1c2   :  { %v585_v22 = vadd.f32 %v581_v21, %v511_v19  ;;  %v1536_v19 = vld [vmem:[%s3832_s6 + $0x180] sm:$0xff]  ;;  %v1531_v21 = vld [vmem:[%s3832_s6 + $0x158] sm:$0xff] }
 0x1c3   :  { %v2361_v23 = vpop.f32.mrf.mxu1 }
 0x1c4   :  { %v655_v24 = vpop.f32.mrf.mxu0  ;;  %v1530_v23 = vld [vmem:[%s3832_s6 + $0x150] sm:$0xff] }
 0x1c5   :  { %v659_v46 = vadd.f32 %v655_v24, %v585_v22  ;;  %v1538_v22 = vld [vmem:[%s3832_s6 + $0x190] sm:$0xff]  ;;  %v1533_v24 = vld [vmem:[%s3832_s6 + $0x168] sm:$0xff] }
 0x1c6   :  { %v2380_v5 = vpop.f32.mrf.mxu0 }
 0x1c7   :  { %v1532_v5 = vld [vmem:[%s3832_s6 + $0x160] sm:$0xff] }
 0x1d3   :  { %v729_v0 = vpop.f32.mrf.mxu1 }
 0x1d4   :  { %v733_v29 = vadd.f32 %v729_v0, %v659_v46  ;;  %v1525_v46 = vld [vmem:[%s3832_s6 + $0x128] sm:$0xff]  ;;  %v1524_v0 = vld [vmem:[%s3832_s6 + $0x120] sm:$0xff] }
 0x1d5   :  { %v2399_v31 = vpop.f32.mrf.mxu1 }
 0x1d6   :  { %v803_v7 = vpop.f32.mrf.mxu0  ;;  %v1519_v31 = vld [vmem:[%s3832_s6 + $0xf8] sm:$0xff] }
 0x1d7   :  { %v3318_v11 = vadd.f32 %v803_v7, %v733_v29  ;;  %v1527_v29 = vld [vmem:[%s3832_s6 + $0x138] sm:$0xff]  ;;  %v1526_v7 = vld [vmem:[%s3832_s6 + $0x130] sm:$0xff] }
 0x1d8   :  { %v2418_v9 = vpop.f32.mrf.mxu0 }
 0x1d9   :  { %v1518_v9 = vld [vmem:[%s3832_s6 + $0xf0] sm:$0xff] }
 0x1de   :  { %v883_v12 = vpop.f32.mrf.mxu1 }
 0x1df   :  { %v884_v13 = vadd.f32 %v883_v12, %v2882_v25  ;;  %v1521_v12 = vld [vmem:[%s3832_s6 + $0x108] sm:$0xff] }
 0x1e0   :  { %v2431_v14 = vpop.f32.mrf.mxu1 }
 0x1e1   :  { %v3321_v15 = vmax.f32 %v884_v13, 0.0  ;;  %v1513_v13 = vld [vmem:[%s3832_s6 + $0xc8] sm:$0xff]  ;;  %v1520_v14 = vld [vmem:[%s3832_s6 + $0x100] sm:$0xff] }
 0x1e3   :  { %2449 = vmatmul.mubr.msk.f32.vlgmr.msra.gmra.mxu0 %vm215_vm3, %v3321_v15  ;;  %v962_v16 = vrot.slane %v3321_v15, 1  ;;  %v1036_v25 = vrot.slane %v3321_v15, 2 }
 0x1e4   :  { %2471 = vmatpush3.msra.mxu0 %v2890_v30  ;;  %2486 = vmatprep.mubr.msk.f32.mxu0 %vm2665_vm1, %v2664_v1  ;;  %v1110_v30 = vrot.slane %v3321_v15, 3 }
 0x1e5   :  { %2472 = vmatprep.subr.mxu0 %v2664_v1  ;;  %2468 = vmatmul.mubr.msk.f32.vlgmr.msra.gmra.mxu1 %vm215_vm3, %v962_v16  ;;  %v1515_v16 = vld [vmem:[%s3832_s6 + $0xd8] sm:$0xff] }
 0x1e6   :  { %2473 = vmatpush3.msra.mxu0 %v2898_v32  ;;  %2490 = vmatpush3.msra.mxu1 %v2903_v33  ;;  %v1184_v32 = vrot.slane %v3321_v15, 4  ;;  %v1258_v33 = vrot.slane %v3321_v15, 5 }
 0x1e7   :  { %2474 = vmatprep.subr.mxu0 %v2664_v1  ;;  %2491 = vmatprep.subr.mxu1 %v2664_v1 }
 0x1e8   :  { %2475 = vmatpush3.msra.mxu0 %v2913_v34  ;;  %2492 = vmatpush3.msra.mxu1 %v2918_v35  ;;  %v3854_v34 = vld [vmem:[#allocation8_spill] sm:$0xff]  ;;  %v3855_v35 = vld [vmem:[#allocation9_spill] sm:$0xff] }
 0x1e9   :  { %2476 = vmatprep.subr.mxu0 %v2664_v1  ;;  %2493 = vmatprep.subr.mxu1 %v2664_v1 }
 0x1ea   :  { %2477 = vmatpush3.msra.mxu0 %v2927_v36  ;;  %2494 = vmatpush3.msra.mxu1 %v2932_v37  ;;  %v3856_v36 = vld [vmem:[#allocation10_spill] sm:$0xff]  ;;  %v3857_v37 = vld [vmem:[#allocation11_spill] sm:$0xff] }
 0x1eb   :  { %2478 = vmatprep.subr.mxu0 %v2664_v1  ;;  %2495 = vmatprep.subr.mxu1 %v2664_v1 }
 0x1ec   :  { %2479 = vmatpush3.msra.mxu0 %v2941_v38  ;;  %2496 = vmatpush3.msra.mxu1 %v2946_v39  ;;  %v3858_v38 = vld [vmem:[#allocation12_spill] sm:$0xff]  ;;  %v3859_v39 = vld [vmem:[#allocation13_spill] sm:$0xff] }
 0x1ed   :  { %2480 = vmatprep.subr.mxu0 %v2664_v1  ;;  %2497 = vmatprep.subr.mxu1 %v2664_v1 }
 0x1ee   :  { %2481 = vmatpush3.msra.mxu0 %v2955_v40  ;;  %2498 = vmatpush3.msra.mxu1 %v2960_v41  ;;  %v3860_v40 = vld [vmem:[#allocation14_spill] sm:$0xff]  ;;  %v3861_v41 = vld [vmem:[#allocation15_spill] sm:$0xff] }
 0x1ef   :  { %2482 = vmatprep.subr.mxu0 %v2664_v1  ;;  %2499 = vmatprep.subr.mxu1 %v2664_v1 }
 0x1f0   :  { %2483 = vmatpush3.msra.mxu0 %v2969_v42  ;;  %2500 = vmatpush3.msra.mxu1 %v2974_v43  ;;  %v1332_v42 = vrot.slane %v3321_v15, 6  ;;  %v1406_v43 = vrot.slane %v3321_v15, 7  ;;  %v1512_v15 = vld [vmem:[%s3832_s6 + $0xc0] sm:$0xff] }
 0x1f1   :  { %2484 = vmatprep.subr.mxu0 %v2664_v1  ;;  %2501 = vmatprep.subr.mxu1 %v2664_v1 }
 0x1f2   :  { %2485 = vmatpush3.msra.mxu0 %v2983_v44  ;;  %2502 = vmatpush3.msra.mxu1 %v2988_v45  ;;  %v1579_v44 = vld [vmem:[%s3832_s6 + $0x2d8] sm:$0xff]  ;;  %v1578_v45 = vld [vmem:[%s3832_s6 + $0x2d0] sm:$0xff] }
 0x1f3   :  { %2487 = vmatmul.mubr.msk.f32.vlgmr.msra.gmra.mxu0 %vm215_vm3, %v1036_v25  ;;  %2503 = vmatprep.subr.mxu1 %v2664_v1  ;;  %v1507_v25 = vld [vmem:[%s3832_s6 + $0x98] sm:$0xff] }
 0x1f4   :  { %2508 = vmatprep.subr.mxu0 %v2664_v1  ;;  %2504 = vmatpush3.msra.mxu1 %v2998_v47  ;;  %v1581_v47 = vld [vmem:[%s3832_s6 + $0x2e8] sm:$0xff] }
 0x1f5   :  { %2505 = vmatprep.mubr.msk.f32.mxu1 %vm2665_vm1, %v2664_v1  ;;  %2509 = vmatpush3.msra.mxu0 %v3005_v48  ;;  %v1573_v48 = vld [vmem:[%s3832_s6 + $0x2a8] sm:$0xff] }
 0x1f6   :  { %2506 = vmatmul.mubr.msk.f32.vlgmr.msra.gmra.mxu1 %vm215_vm3, %v1110_v30  ;;  %2510 = vmatprep.subr.mxu0 %v2664_v1  ;;  %v1514_v30 = vld [vmem:[%s3832_s6 + $0xd0] sm:$0xff] }
 0x1f7   :  { %2527 = vmatprep.subr.mxu1 %v2664_v1  ;;  %2511 = vmatpush3.msra.mxu0 %v3015_v50  ;;  %v1580_v50 = vld [vmem:[%s3832_s6 + $0x2e0] sm:$0xff] }
 0x1f8   :  { %2528 = vmatpush3.msra.mxu1 %v3023_v51  ;;  %2512 = vmatprep.subr.mxu0 %v2664_v1  ;;  %v1572_v51 = vld [vmem:[%s3832_s6 + $0x2a0] sm:$0xff] }
 0x1f9   :  { %2529 = vmatprep.subr.mxu1 %v2664_v1  ;;  %2513 = vmatpush3.msra.mxu0 %v3030_v52  ;;  %v1575_v52 = vld [vmem:[%s3832_s6 + $0x2b8] sm:$0xff] }
 0x1fa   :  { %2530 = vmatpush3.msra.mxu1 %v3037_v53  ;;  %2514 = vmatprep.subr.mxu0 %v2664_v1  ;;  %v1567_v53 = vld [vmem:[%s3832_s6 + $0x278] sm:$0xff] }
 0x1fb   :  { %2531 = vmatprep.subr.mxu1 %v2664_v1  ;;  %2515 = vmatpush3.msra.mxu0 %v3044_v54  ;;  %v1574_v54 = vld [vmem:[%s3832_s6 + $0x2b0] sm:$0xff] }
 0x1fc   :  { %2532 = vmatpush3.msra.mxu1 %v3051_v55  ;;  %2516 = vmatprep.subr.mxu0 %v2664_v1  ;;  %v1566_v55 = vld [vmem:[%s3832_s6 + $0x270] sm:$0xff] }
 0x1fd   :  { %2533 = vmatprep.subr.mxu1 %v2664_v1  ;;  %2517 = vmatpush3.msra.mxu0 %v3058_v56  ;;  %v1569_v56 = vld [vmem:[%s3832_s6 + $0x288] sm:$0xff] }
 0x1fe   :  { %2534 = vmatpush3.msra.mxu1 %v3065_v57  ;;  %2518 = vmatprep.subr.mxu0 %v2664_v1  ;;  %v1561_v57 = vld [vmem:[%s3832_s6 + $0x248] sm:$0xff] }
 0x1ff   :  { %2535 = vmatprep.subr.mxu1 %v2664_v1  ;;  %2519 = vmatpush3.msra.mxu0 %v3072_v58  ;;  %v1568_v58 = vld [vmem:[%s3832_s6 + $0x280] sm:$0xff] }
 0x200   :  { %2536 = vmatpush3.msra.mxu1 %v3079_v59  ;;  %2520 = vmatprep.subr.mxu0 %v2664_v1  ;;  %v1563_v59 = vld [vmem:[%s3832_s6 + $0x258] sm:$0xff] }
 0x201   :  { %2537 = vmatprep.subr.mxu1 %v2664_v1  ;;  %2521 = vmatpush3.msra.mxu0 %v3086_v60  ;;  %v1560_v60 = vld [vmem:[%s3832_s6 + $0x240] sm:$0xff] }
 0x202   :  { %2538 = vmatpush3.msra.mxu1 %v3093_v61  ;;  %2522 = vmatprep.subr.mxu0 %v2664_v1  ;;  %v1562_v61 = vld [vmem:[%s3832_s6 + $0x250] sm:$0xff] }
 0x203   :  { %2539 = vmatprep.subr.mxu1 %v2664_v1  ;;  %2523 = vmatpush3.msra.mxu0 %v3100_v62  ;;  %v1555_v62 = vld [vmem:[%s3832_s6 + $0x218] sm:$0xff] }
 0x204   :  { %2524 = vmatprep.mubr.msk.f32.mxu0 %vm2665_vm1, %v2664_v1  ;;  %2540 = vmatpush3.msra.mxu1 %v3107_v63  ;;  %v1554_v63 = vld [vmem:[%s3832_s6 + $0x210] sm:$0xff] }
 0x205   :  { %2525 = vmatmul.mubr.msk.f32.vlgmr.msra.gmra.mxu0 %vm215_vm3, %v1184_v32  ;;  %2541 = vmatprep.subr.mxu1 %v2664_v1  ;;  %v1506_v32 = vld [vmem:[%s3832_s6 + $0x90] sm:$0xff] }
 0x206   :  { %2546 = vmatprep.subr.mxu0 %v2664_v1  ;;  %2542 = vmatpush3.msra.mxu1 %v3117_v2  ;;  %v1557_v2 = vld [vmem:[%s3832_s6 + $0x228] sm:$0xff] }
 0x207   :  { %2543 = vmatprep.mubr.msk.f32.mxu1 %vm2665_vm1, %v2664_v1  ;;  %2547 = vmatpush3.msra.mxu0 %v3125_v3  ;;  %v1549_v3 = vld [vmem:[%s3832_s6 + $0x1e8] sm:$0xff] }
 0x208   :  { %2544 = vmatmul.mubr.msk.f32.vlgmr.msra.gmra.mxu1 %vm215_vm3, %v1258_v33  ;;  %2548 = vmatprep.subr.mxu0 %v2664_v1  ;;  %v1509_v33 = vld [vmem:[%s3832_s6 + $0xa8] sm:$0xff] }
 0x209   :  { %2565 = vmatprep.subr.mxu1 %v2664_v1  ;;  %2549 = vmatpush3.msra.mxu0 %v3135_v6  ;;  %v1556_v6 = vld [vmem:[%s3832_s6 + $0x220] sm:$0xff] }
 0x20a   :  { %2566 = vmatpush3.msra.mxu1 %v3143_v8  ;;  %2550 = vmatprep.subr.mxu0 %v2664_v1  ;;  %v1548_v8 = vld [vmem:[%s3832_s6 + $0x1e0] sm:$0xff] }
 0x20b   :  { %2567 = vmatprep.subr.mxu1 %v2664_v1  ;;  %2551 = vmatpush3.msra.mxu0 %v3150_v10  ;;  %v1551_v10 = vld [vmem:[%s3832_s6 + $0x1f8] sm:$0xff] }
 0x20c   :  { %2568 = vmatpush3.msra.mxu1 %v3157_v26  ;;  %2552 = vmatprep.subr.mxu0 %v2664_v1  ;;  %v1543_v26 = vld [vmem:[%s3832_s6 + $0x1b8] sm:$0xff] }
 0x20d   :  { %2569 = vmatprep.subr.mxu1 %v2664_v1  ;;  %2553 = vmatpush3.msra.mxu0 %v3164_v27  ;;  %v1550_v27 = vld [vmem:[%s3832_s6 + $0x1f0] sm:$0xff] }
 0x20e   :  { %2570 = vmatpush3.msra.mxu1 %v3854_v34  ;;  %2554 = vmatprep.subr.mxu0 %v2664_v1  ;;  %v1501_v34 = vld [vmem:[%s3832_s6 + $0x68] sm:$0xff] }
 0x20f   :  { %2571 = vmatprep.subr.mxu1 %v2664_v1  ;;  %2555 = vmatpush3.msra.mxu0 %v3855_v35  ;;  %v1508_v35 = vld [vmem:[%s3832_s6 + $0xa0] sm:$0xff] }
 0x210   :  { %2572 = vmatpush3.msra.mxu1 %v3856_v36  ;;  %2556 = vmatprep.subr.mxu0 %v2664_v1  ;;  %v1500_v36 = vld [vmem:[%s3832_s6 + $0x60] sm:$0xff] }
 0x211   :  { %2573 = vmatprep.subr.mxu1 %v2664_v1  ;;  %2557 = vmatpush3.msra.mxu0 %v3857_v37  ;;  %v1503_v37 = vld [vmem:[%s3832_s6 + $0x78] sm:$0xff] }
 0x212   :  { %2574 = vmatpush3.msra.mxu1 %v3858_v38  ;;  %2558 = vmatprep.subr.mxu0 %v2664_v1  ;;  %v1495_v38 = vld [vmem:[%s3832_s6 + $0x38] sm:$0xff] }
 0x213   :  { %2575 = vmatprep.subr.mxu1 %v2664_v1  ;;  %2559 = vmatpush3.msra.mxu0 %v3859_v39  ;;  %v1502_v39 = vld [vmem:[%s3832_s6 + $0x70] sm:$0xff] }
 0x214   :  { %2576 = vmatpush3.msra.mxu1 %v3860_v40  ;;  %2560 = vmatprep.subr.mxu0 %v2664_v1  ;;  %v1494_v40 = vld [vmem:[%s3832_s6 + $0x30] sm:$0xff] }
 0x215   :  { %2577 = vmatprep.subr.mxu1 %v2664_v1  ;;  %2561 = vmatpush3.msra.mxu0 %v3861_v41  ;;  %v1497_v41 = vld [vmem:[%s3832_s6 + $0x48] sm:$0xff] }
 0x216   :  { %2562 = vmatprep.mubr.msk.f32.mxu0 %vm2665_vm1, %v2664_v1  ;;  %2578 = vmatpush3.msra.mxu1 %v3227_v49  ;;  %v1545_v49 = vld [vmem:[%s3832_s6 + $0x1c8] sm:$0xff] }
 0x217   :  { %2563 = vmatmul.mubr.msk.f32.vlgmr.msra.gmra.mxu0 %vm215_vm3, %v1332_v42  ;;  %2579 = vmatprep.subr.mxu1 %v2664_v1  ;;  %v1489_v42 = vld [vmem:[%s3832_s6 + $0x8] sm:$0xff] }
 0x218   :  { %2580 = vmatpush3.msra.mxu1 %v3237_v28  ;;  %2581 = vmatprep.mubr.msk.f32.mxu1 %vm2665_vm1, %v2664_v1  ;;  %v1542_v28 = vld [vmem:[%s3832_s6 + $0x1b0] sm:$0xff] }
 0x219   :  { %2582 = vmatmul.mubr.msk.f32.vlgmr.msra.gmra.mxu1 %vm215_vm3, %v1406_v43  ;;  %1648 = vmatprep.mubr.f32.mxu0 %v2664_v1  ;;  %v1496_v43 = vld [vmem:[%s3832_s6 + $0x40] sm:$0xff] }
 0x21a   :  { %1719 = vmatprep.mubr.f32.mxu1 %v2664_v1  ;;  %1584 = vmatprep.subr.mxu0 %v1579_v44  ;;  %v1488_v44 = vld [vmem:[%s3832_s6] sm:$0xff] }
 0x21b   :  { %1655 = vmatprep.subr.mxu1 %v1581_v47  ;;  %1585 = vmatpush1.msra.mxu0 %v1578_v45  ;;  %v1491_v45 = vld [vmem:[%s3832_s6 + $0x18] sm:$0xff]  ;;  %v1490_v47 = vld [vmem:[%s3832_s6 + $0x10] sm:$0xff] }
 0x21c   :  { %1656 = vmatpush1.msra.mxu1 %v1580_v50  ;;  %1586 = vmatprep.subr.mxu0 %v1573_v48  ;;  %v1583_v48 = vld [vmem:[%s3832_s6 + $0x2f8] sm:$0xff] }
 0x21d   :  { %1657 = vmatprep.subr.mxu1 %v1575_v52  ;;  %1587 = vmatpush1.msra.mxu0 %v1572_v51 }
 0x21e   :  { %1658 = vmatpush1.msra.mxu1 %v1574_v54  ;;  %1588 = vmatprep.subr.mxu0 %v1567_v53 }
 0x21f   :  { %1659 = vmatprep.subr.mxu1 %v1569_v56  ;;  %1589 = vmatpush1.msra.mxu0 %v1566_v55 }
 0x220   :  { %1660 = vmatpush1.msra.mxu1 %v1568_v58  ;;  %1590 = vmatprep.subr.mxu0 %v1561_v57 }
 0x221   :  { %1661 = vmatprep.subr.mxu1 %v1563_v59  ;;  %1591 = vmatpush1.msra.mxu0 %v1560_v60 }
 0x222   :  { %1662 = vmatpush1.msra.mxu1 %v1562_v61  ;;  %1592 = vmatprep.subr.mxu0 %v1555_v62 }
 0x223   :  { %1593 = vmatpush1.msra.mxu0 %v1554_v63  ;;  %1663 = vmatprep.subr.mxu1 %v1557_v2 }
 0x224   :  { %1594 = vmatprep.subr.mxu0 %v1549_v3  ;;  %1664 = vmatpush1.msra.mxu1 %v1556_v6  ;;  %v1481_v6 = vlaneseq }
 0x225   :  { %1595 = vmatpush1.msra.mxu0 %v1548_v8  ;;  %1665 = vmatprep.subr.mxu1 %v1551_v10 }
 0x226   :  { %1596 = vmatprep.subr.mxu0 %v1543_v26  ;;  %1666 = vmatpush1.msra.mxu1 %v1550_v27  ;;  %v1482_v10 = vshrl.u32 %v1481_v6, 7 }
 0x227   :  { %1597 = vmatpush1.msra.mxu0 %v1542_v28  ;;  %1667 = vmatprep.subr.mxu1 %v1545_v49 }
 0x228   :  { %1598 = vmatprep.subr.mxu0 %v1537_v17  ;;  %1668 = vmatpush1.msra.mxu1 %v1544_v18  ;;  %v1483_v49 = vsub.s32 0, %v1482_v10  ;;  %v1802_v10 = vstv %s2069_s20 }
 0x229   :  { %1599 = vmatpush1.msra.mxu0 %v1536_v19  ;;  %1669 = vmatprep.subr.mxu1 %v1539_v20 }
 0x22a   :  { %1600 = vmatprep.subr.mxu0 %v1531_v21  ;;  %1670 = vmatpush1.msra.mxu1 %v1538_v22 }
 0x22b   :  { %1601 = vmatpush1.msra.mxu0 %v1530_v23  ;;  %1671 = vmatprep.subr.mxu1 %v1533_v24  ;;  %v1577_v23 = vld [vmem:[%s3832_s6 + $0x2c8] sm:$0xff]  ;;  %v1576_v24 = vld [vmem:[%s3832_s6 + $0x2c0] sm:$0xff] }
 0x22c   :  { %1602 = vmatprep.subr.mxu0 %v1525_v46  ;;  %1672 = vmatpush1.msra.mxu1 %v1532_v5  ;;  %v1571_v46 = vld [vmem:[%s3832_s6 + $0x298] sm:$0xff]  ;;  %v1565_v5 = vld [vmem:[%s3832_s6 + $0x268] sm:$0xff] }
 0x22d   :  { %1603 = vmatpush1.msra.mxu0 %v1524_v0  ;;  %1673 = vmatprep.subr.mxu1 %v1527_v29  ;;  %v1564_v0 = vld [vmem:[%s3832_s6 + $0x260] sm:$0xff]  ;;  %v1559_v29 = vld [vmem:[%s3832_s6 + $0x238] sm:$0xff] }
 0x22e   :  { %1604 = vmatprep.subr.mxu0 %v1519_v31  ;;  %1674 = vmatpush1.msra.mxu1 %v1526_v7  ;;  %v1558_v31 = vld [vmem:[%s3832_s6 + $0x230] sm:$0xff]  ;;  %v1553_v7 = vld [vmem:[%s3832_s6 + $0x208] sm:$0xff] }
 0x22f   :  { %1605 = vmatpush1.msra.mxu0 %v1518_v9  ;;  %1675 = vmatprep.subr.mxu1 %v1521_v12  ;;  %v1552_v9 = vld [vmem:[%s3832_s6 + $0x200] sm:$0xff]  ;;  %v1547_v12 = vld [vmem:[%s3832_s6 + $0x1d8] sm:$0xff] }
 0x230   :  { %1606 = vmatprep.subr.mxu0 %v1513_v13  ;;  %1676 = vmatpush1.msra.mxu1 %v1520_v14  ;;  %v1546_v13 = vld [vmem:[%s3832_s6 + $0x1d0] sm:$0xff]  ;;  %v1541_v14 = vld [vmem:[%s3832_s6 + $0x1a8] sm:$0xff] }
 0x231   :  { %1607 = vmatpush1.msra.mxu0 %v1512_v15  ;;  %1677 = vmatprep.subr.mxu1 %v1515_v16  ;;  %v1540_v15 = vld [vmem:[%s3832_s6 + $0x1a0] sm:$0xff]  ;;  %v1535_v16 = vld [vmem:[%s3832_s6 + $0x178] sm:$0xff] }
 0x232   :  { %1608 = vmatprep.subr.mxu0 %v1507_v25  ;;  %1678 = vmatpush1.msra.mxu1 %v1514_v30  ;;  %v1534_v25 = vld [vmem:[%s3832_s6 + $0x170] sm:$0xff]  ;;  %v1529_v30 = vld [vmem:[%s3832_s6 + $0x148] sm:$0xff] }
 0x233   :  { %1609 = vmatpush1.msra.mxu0 %v1506_v32  ;;  %1679 = vmatprep.subr.mxu1 %v1509_v33  ;;  %v1528_v32 = vld [vmem:[%s3832_s6 + $0x140] sm:$0xff]  ;;  %v1523_v33 = vld [vmem:[%s3832_s6 + $0x118] sm:$0xff] }
 0x234   :  { %1610 = vmatprep.subr.mxu0 %v1501_v34  ;;  %1680 = vmatpush1.msra.mxu1 %v1508_v35  ;;  %v1522_v34 = vld [vmem:[%s3832_s6 + $0x110] sm:$0xff]  ;;  %v1517_v35 = vld [vmem:[%s3832_s6 + $0xe8] sm:$0xff] }
 0x235   :  { %1611 = vmatpush1.msra.mxu0 %v1500_v36  ;;  %1681 = vmatprep.subr.mxu1 %v1503_v37  ;;  %v1516_v36 = vld [vmem:[%s3832_s6 + $0xe0] sm:$0xff]  ;;  %v1511_v37 = vld [vmem:[%s3832_s6 + $0xb8] sm:$0xff] }
 0x236   :  { %1612 = vmatprep.subr.mxu0 %v1495_v38  ;;  %1682 = vmatpush1.msra.mxu1 %v1502_v39  ;;  %v1510_v38 = vld [vmem:[%s3832_s6 + $0xb0] sm:$0xff]  ;;  %v1505_v39 = vld [vmem:[%s3832_s6 + $0x88] sm:$0xff] }
 0x237   :  { %1613 = vmatpush1.msra.mxu0 %v1494_v40  ;;  %1683 = vmatprep.subr.mxu1 %v1497_v41  ;;  %v1504_v40 = vld [vmem:[%s3832_s6 + $0x80] sm:$0xff]  ;;  %v1499_v41 = vld [vmem:[%s3832_s6 + $0x58] sm:$0xff] }
 0x238   :  { %1614 = vmatprep.subr.mxu0 %v1489_v42  ;;  %1684 = vmatpush1.msra.mxu1 %v1496_v43  ;;  %v1498_v42 = vld [vmem:[%s3832_s6 + $0x50] sm:$0xff]  ;;  %v1493_v43 = vld [vmem:[%s3832_s6 + $0x28] sm:$0xff] }
 0x239   :  { %1615 = vmatpush1.msra.mxu0 %v1488_v44  ;;  %1685 = vmatprep.subr.mxu1 %v1491_v45  ;;  %v1492_v44 = vld [vmem:[%s3832_s6 + $0x20] sm:$0xff]  ;;  %v1893_v45 = vld [vmem:[%s3835_s9 + $0x78] sm:$0xff] }
 0x23a   :  { %1686 = vmatpush1.msra.mxu1 %v1490_v47  ;;  %1726 = vmatprep.subr.mxu0 %v1583_v48  ;;  %v1892_v47 = vld [vmem:[%s3835_s9 + $0x70] sm:$0xff]  ;;  %v1891_v48 = vld [vmem:[%s3835_s9 + $0x68] sm:$0xff] }
 0x23b   :  { %2584 = vmatprep.subr.mxu1 %v2664_v1 }
 0x2a3   :  { %v957_v50 = vpop.f32.mrf.mxu0 }
 0x2a4   :  { %v961_v59 = vadd.f32 %v957_v50, %v3315_v4  ;;  %v1582_v4 = vld [vmem:[%s3832_s6 + $0x2f0] sm:$0xff]  ;;  %v1890_v50 = vld [vmem:[%s3835_s9 + $0x60] sm:$0xff] }
 0x2a5   :  { %v2450_v51 = vpop.f32.mrf.mxu0  ;;  %v1031_v52 = vpop.f32.mrf.mxu1 }
 0x2a6   :  { %v1035_v62 = vadd.f32 %v1031_v52, %v961_v59  ;;  %v1889_v51 = vld [vmem:[%s3835_s9 + $0x58] sm:$0xff]  ;;  %v1888_v52 = vld [vmem:[%s3835_s9 + $0x50] sm:$0xff] }
 0x2a7   :  { %v2469_v53 = vpop.f32.mrf.mxu1  ;;  %v1881_v59 = vld [vmem:[%s3835_s9 + $0x18] sm:$0xff] }
 0x2a8   :  { %v1887_v53 = vld [vmem:[%s3835_s9 + $0x48] sm:$0xff] }
 0x2b3   :  { %v1105_v54 = vpop.f32.mrf.mxu0 }
 0x2b4   :  { %v1109_v2 = vadd.f32 %v1105_v54, %v1035_v62  ;;  %v1886_v54 = vld [vmem:[%s3835_s9 + $0x40] sm:$0xff] }
 0x2b5   :  { %v2488_v55 = vpop.f32.mrf.mxu0  ;;  %v1878_v62 = vld [vmem:[%s3835_s9] sm:$0xff] }
 0x2b6   :  { %v1179_v56 = vpop.f32.mrf.mxu1  ;;  %v1885_v55 = vld [vmem:[%s3835_s9 + $0x38] sm:$0xff] }
 0x2b7   :  { %v1183_v3 = vadd.f32 %v1179_v56, %v1109_v2  ;;  %v1884_v56 = vld [vmem:[%s3835_s9 + $0x30] sm:$0xff] }
 0x2b8   :  { %v2507_v57 = vpop.f32.mrf.mxu1 }
 0x2b9   :  { %v1883_v57 = vld [vmem:[%s3835_s9 + $0x28] sm:$0xff] }
 0x2c5   :  { %v1253_v58 = vpop.f32.mrf.mxu0 }
 0x2c6   :  { %v1257_v8 = vadd.f32 %v1253_v58, %v1183_v3  ;;  %v1882_v58 = vld [vmem:[%s3835_s9 + $0x20] sm:$0xff]  ;;  %v1818_v3 = vstv %s2073_s1 }
 0x2c7   :  { %v2526_v60 = vpop.f32.mrf.mxu0 }
 0x2c8   :  { %v1327_v61 = vpop.f32.mrf.mxu1  ;;  %v1880_v60 = vld [vmem:[%s3835_s9 + $0x10] sm:$0xff] }
 0x2c9   :  { %v1331_v26 = vadd.f32 %v1327_v61, %v1257_v8  ;;  %v1879_v61 = vld [vmem:[%s3835_s9 + $0x8] sm:$0xff] }
 0x2ca   :  { %v2545_v63 = vpop.f32.mrf.mxu1 }
 0x2d7   :  { %v1401_v27 = vpop.f32.mrf.mxu0 }
 0x2d8   :  { %v1405_v28 = vadd.f32 %v1401_v27, %v1331_v26  ;;  %v1822_v26 = vstv %s2074_s5 }
 0x2d9   :  { %v2564_v17 = vpop.f32.mrf.mxu0  ;;  %v1475_v18 = vpop.f32.mrf.mxu1 }
 0x2da   :  { %v1479_v19 = vadd.f32 %v1475_v18, %v1405_v28  ;;  %v1826_v17 = vstv %s2075_s22 }
 0x2db   :  { %v2583_v20 = vpop.f32.mrf.mxu1 }
 0x2dc   :  { %v1484_v21 = vrot.slane %v1479_v19, %v1483_v49  ;;  %v1806_v49 = vstv %s2070_s21 }
 0x2de   :  { %v3649_v22 = vsel %vm1486_vm4, %v3318_v11, %v1484_v21  ;;  %v1570_v11 = vld [vmem:[%s3832_s6 + $0x290] sm:$0xff]  ;;  %s1797_s6 = sld [smem:[#allocation2]] }
 0x2df   :  { %1649 = vmatmul.mubr.f32.vlgmr.msra.gmra.mxu0 %v3649_v22  ;;  %1720 = vmatmul.mubr.f32.vlgmr.msra.gmra.mxu1 %v3649_v22 }
 0x2e0   :  { %1727 = vmatpush1.msra.mxu0 %v1582_v4  ;;  %1790 = vmatprep.mubr.f32.mxu0 %v2664_v1 }
 0x2e1   :  { %1728 = vmatprep.subr.mxu0 %v1577_v23  ;;  %2616 = vmatprep.mubr.msk.f32.mxu1 %vm2665_vm1, %v2664_v1  ;;  %v1810_v23 = vstv %s2071_s23 }
 0x2e2   :  { %1729 = vmatpush1.msra.mxu0 %v1576_v24  ;;  %2585 = vmatpush3.msra.mxu1 %v1893_v45  ;;  %v1830_v24 = vstv %s2076_s0 }
 0x2e3   :  { %1730 = vmatprep.subr.mxu0 %v1571_v46  ;;  %2586 = vmatprep.subr.mxu1 %v2664_v1 }
 0x2e4   :  { %1731 = vmatpush1.msra.mxu0 %v1570_v11  ;;  %2587 = vmatpush3.msra.mxu1 %v1892_v47  ;;  %v1798_v2 = vstv %s1797_s6 }
 0x2e5   :  { %1732 = vmatprep.subr.mxu0 %v1565_v5  ;;  %2588 = vmatprep.subr.mxu1 %v2664_v1 }
 0x2e6   :  { %1733 = vmatpush1.msra.mxu0 %v1564_v0  ;;  %2589 = vmatpush3.msra.mxu1 %v1891_v48 }
 0x2e7   :  { %1734 = vmatprep.subr.mxu0 %v1559_v29  ;;  %2590 = vmatprep.subr.mxu1 %v2664_v1  ;;  %v1814_v29 = vstv %s3810_s2 }
 0x2e8   :  { %1735 = vmatpush1.msra.mxu0 %v1558_v31  ;;  %2591 = vmatpush3.msra.mxu1 %v1890_v50  ;;  %v1834_v31 = vstv %s2077_s24 }
 0x2e9   :  { %1736 = vmatprep.subr.mxu0 %v1553_v7  ;;  %2592 = vmatprep.subr.mxu1 %v2664_v1 }
 0x2ea   :  { %1737 = vmatpush1.msra.mxu0 %v1552_v9  ;;  %2593 = vmatpush3.msra.mxu1 %v1889_v51 }
 0x2eb   :  { %1738 = vmatprep.subr.mxu0 %v1547_v12  ;;  %2594 = vmatprep.subr.mxu1 %v2664_v1 }
 0x2ec   :  { %1739 = vmatpush1.msra.mxu0 %v1546_v13  ;;  %2595 = vmatpush3.msra.mxu1 %v1888_v52 }
 0x2ed   :  { %1740 = vmatprep.subr.mxu0 %v1541_v14  ;;  %2596 = vmatprep.subr.mxu1 %v2664_v1 }
 0x2ee   :  { %1741 = vmatpush1.msra.mxu0 %v1540_v15  ;;  %2597 = vmatpush3.msra.mxu1 %v1887_v53 }
 0x2ef   :  { %1742 = vmatprep.subr.mxu0 %v1535_v16  ;;  %2598 = vmatprep.subr.mxu1 %v2664_v1 }
 0x2f0   :  { %1743 = vmatpush1.msra.mxu0 %v1534_v25  ;;  %2599 = vmatpush3.msra.mxu1 %v1886_v54 }
 0x2f1   :  { %1744 = vmatprep.subr.mxu0 %v1529_v30  ;;  %2600 = vmatprep.subr.mxu1 %v2664_v1 }
 0x2f2   :  { %1745 = vmatpush1.msra.mxu0 %v1528_v32  ;;  %2601 = vmatpush3.msra.mxu1 %v1885_v55 }
 0x2f3   :  { %1746 = vmatprep.subr.mxu0 %v1523_v33  ;;  %2602 = vmatprep.subr.mxu1 %v2664_v1 }
 0x2f4   :  { %1747 = vmatpush1.msra.mxu0 %v1522_v34  ;;  %2603 = vmatpush3.msra.mxu1 %v1884_v56  ;;  %v2078_v56 = vld [vmem:[%s3833_s7] ss:$0 sm:$0xff]  ;;  %s2639_s7 = scalar_lea.vmem %s1980_s12, 32 }
 0x2f5   :  { %1748 = vmatprep.subr.mxu0 %v1517_v35  ;;  %2604 = vmatprep.subr.mxu1 %v2664_v1  ;;  %p2640_p5 = scmp.ne.s32.totalorder %s1980_s12, %s2639_s7  ;;  %p2645_p7 = scmp.lt.s32.totalorder %s2639_s7, %s2639_s7 }
 0x2f6   :  { %1749 = vmatpush1.msra.mxu0 %v1516_v36  ;;  %2605 = vmatpush3.msra.mxu1 %v1883_v57 }
 0x2f7   :  { %1750 = vmatprep.subr.mxu0 %v1511_v37  ;;  %2606 = vmatprep.subr.mxu1 %v2664_v1  ;;  %p2646_p8 = por %p2645_p7, %p2644_p6 }
 0x2f8   :  { %1751 = vmatpush1.msra.mxu0 %v1510_v38  ;;  %2607 = vmatpush3.msra.mxu1 %v1882_v58  ;;  %v2079_v58 = vld [vmem:[%s3834_s8] ss:$0 sm:$0xff] }
 0x2f9   :  { %1752 = vmatprep.subr.mxu0 %v1505_v39  ;;  %2608 = vmatprep.subr.mxu1 %v2664_v1  ;;  %p2647_p9 = pnand %p2646_p8, %p2640_p5 }
 0x2fa   :  { %1753 = vmatpush1.msra.mxu0 %v1504_v40  ;;  %2609 = vmatpush3.msra.mxu1 %v1881_v59 }
 0x2fb   :  { %1754 = vmatprep.subr.mxu0 %v1499_v41  ;;  %2610 = vmatprep.subr.mxu1 %v2664_v1 }
 0x2fc   :  { %1755 = vmatpush1.msra.mxu0 %v1498_v42  ;;  %2611 = vmatpush3.msra.mxu1 %v1880_v60 }
 0x2fd   :  { %1756 = vmatprep.subr.mxu0 %v1493_v43  ;;  %2612 = vmatprep.subr.mxu1 %v2664_v1 }
 0x2fe   :  { %1757 = vmatpush1.msra.mxu0 %v1492_v44  ;;  %2613 = vmatpush3.msra.mxu1 %v1879_v61 }
 0x2ff   :  { %1791 = vmatmul.mubr.f32.vlgmr.msra.gmra.mxu0 %v3649_v22  ;;  %2614 = vmatprep.subr.mxu1 %v2664_v1 }
 0x300   :  { %2615 = vmatpush3.msra.mxu1 %v1878_v62  ;;  %v2080_v62 = vld [vmem:[%s3836_s10] ss:$0 sm:$0xff] }
 0x39f   :  { %v1650_v63 = vpop.f32.mrf.mxu0  ;;  %v1721_v8 = vpop.f32.mrf.mxu1 }
 0x3a0   :  { %v1799_v27 = vmul.f32 %v1798_v2, %v1650_v63  ;;  %v1819_v28 = vmul.f32 %v1818_v3, %v1650_v63  ;;  %v1807_v46 = vmul.f32 %v1806_v49, %v1721_v8  ;;  %v1827_v11 = vmul.f32 %v1826_v17, %v1721_v8 }
 0x3a1   :  { %v1652_v6 = vpop.f32.mrf.mxu0  ;;  %v1723_v22 = vpop.f32.mrf.mxu1 }
 0x3a2   :  { %v1803_v19 = vmul.f32 %v1802_v10, %v1652_v6  ;;  %v1823_v20 = vmul.f32 %v1822_v26, %v1652_v6  ;;  %v1811_v7 = vmul.f32 %v1810_v23, %v1723_v22  ;;  %v1831_v9 = vmul.f32 %v1830_v24, %v1723_v22 }
 0x3bf   :  { %v1792_v1 = vpop.f32.mrf.mxu0 }
 0x3c0   :  { %v1815_v14 = vmul.f32 %v1814_v29, %v1792_v1  ;;  %v1835_v15 = vmul.f32 %v1834_v31, %v1792_v1 }
 0x3c1   :  { %v1794_v18 = vpop.f32.mrf.mxu0 }
 0x3c2   :  { %v1800_v21 = vadd.f32 %v1799_v27, %v1794_v18  ;;  %v1820_v4 = vadd.f32 %v1819_v28, %v1794_v18 }
 0x3c4   :  { %v1804_v5 = vadd.f32 %v1803_v19, %v1800_v21  ;;  %v1824_v0 = vadd.f32 %v1823_v20, %v1820_v4 }
 0x3c6   :  { %v1808_v12 = vadd.f32 %v1807_v46, %v1804_v5  ;;  %v1828_v13 = vadd.f32 %v1827_v11, %v1824_v0 }
 0x3c8   :  { %v1812_v16 = vadd.f32 %v1811_v7, %v1808_v12  ;;  %v1832_v25 = vadd.f32 %v1831_v9, %v1828_v13 }
 0x3ca   :  { %v1816_v30 = vadd.f32 %v1815_v14, %v1812_v16  ;;  %v1836_v32 = vadd.f32 %v1835_v15, %v1832_v25 }
 0x3cc   :  { %v1837_v33 = vsel %vm1486_vm4, %v1816_v30, %v1836_v32 }
 0x3cd   :  { %v1839_v34 = vsel %vm1838_vm5, %v1837_v33, 0.0 }
 0x3ce   :  { %v1840_v35 = vrot.slane %v1839_v34, 4 }
 0x3d0   :  { %v1841_v36 = vadd.f32 %v1840_v35, %v1839_v34 }
 0x3d2   :  { %v1842_v37 = vrot.slane %v1841_v36, 2 }
 0x3d4   :  { %v1843_v38 = vadd.f32 %v1842_v37, %v1841_v36 }
 0x3d6   :  { %v1844_v39 = vrot.slane %v1843_v38, 1 }
 0x3d8   :  { %v1845_v40 = vadd.f32 %v1844_v39, %v1843_v38 }
 0x3da   :  { %v1847_v41 = vmul.f32 0.5, %v1845_v40 }
 0x3dc   :  { %v1848_v42 = vsub.f32 %v1837_v33, %v1847_v41 }
 0x3de   :  { %v1849_v43 = vmul.f32 %v1848_v42, %v1848_v42 }
 0x3e0   :  { %v1850_v44 = vsel %vm1838_vm5, %v1849_v43, 0.0 }
 0x3e1   :  { %v1851_v45 = vrot.slane %v1850_v44, 4 }
 0x3e3   :  { %v1852_v47 = vadd.f32 %v1851_v45, %v1850_v44 }
 0x3e5   :  { %v1853_v48 = vrot.slane %v1852_v47, 2 }
 0x3e7   :  { %v1854_v50 = vadd.f32 %v1853_v48, %v1852_v47 }
 0x3e9   :  { %v1855_v51 = vrot.slane %v1854_v50, 1 }
 0x3eb   :  { %v1856_v52 = vadd.f32 %v1855_v51, %v1854_v50 }
 0x3ed   :  { %v1857_v53 = vmul.f32 0.5, %v1856_v52 }
 0x3ef   :  { %v1858_v54 = vadd.f32 1e-05, %v1857_v53 }
 0x3f1   :  { %2625 = vrsqrt.f32 %v1858_v54 }
 0x3fe   :  { %v2626_v55 = vpop.eup %2625 }
 0x3ff   :  { %v1860_v57 = vmul.f32 %v2626_v55, %v1848_v42 }
 0x401   :  { %v1868_v59 = vmul.f32 %v2078_v56, %v1860_v57 }
 0x403   :  { %v1876_v60 = vadd.f32 %v2079_v58, %v1868_v59 }
 0x405   :  { %v1877_v61 = vmax.f32 %v1876_v60, 0.0 }
 0x407   :  { %2617 = vmatmul.mubr.f32.vlgmr.msra.gmra.mxu1 %v1877_v61 }
 0x4c7   :  { %v1967_v63 = vpop.f32.mrf.mxu1 }
 0x4c8   :  { %v1968_v2 = vadd.f32 %v2080_v62, %v1967_v63 }
 0x4c9   :  { %v2618_v3 = vpop.f32.mrf.mxu1 }
 0x4ca   :  { %1972 = vst.msk [vmem:[#allocation5] sm:$0x3] %vm1971_vm6, %v1968_v2 }
 0x4cb   :  { %2650 = shalt.err (!%p2647_p9)
}
 0x4cc   :  { %1982 = dma.vmem_to_hbm [thread:$0]  %s1980_s12, 32, %s3837_s11, [#allocation3]  }
 0x4cd   :  { %2661 = dma.done.wait [#allocation3], 32  }
 0x4ce   :  { %2662 = vsyncadd [#allocation3], 4294967264 }
 0x4cf   :  { %1986 = vsyncpa [#allocation3], 1 }
 0x4d0   :  { %1987 = vsyncpa [#allocation4], 1 }

</bundles_post_ra>
